<compile_context>
chip_gen: v7x
topology: tpu7x:2x2x1
jax: 0.10.0
libtpu: 0.0.40
codegen_flags: <defaults>
</compile_context>

<pallas_src>
import math

import jax
import jax.numpy as jnp
from jax.experimental import pallas as pl
from jax.experimental.pallas import tpu as pltpu

# ----------------------------- configuration --------------------------------
B = 2            # batch
CX = 2           # channels of raw x
CJ = 1           # channels of joints condition
T = 8            # n_frames   (== `batch_size` kwarg -> pos_embed length)
J = 16           # n_joints   (== image_size -> ConditionProjection output dim)
COND_IN = 5      # in_dim[0] of ConditionProjection
C_IN = CX + CJ   # `in_channels` kwarg (channels after concatenation)
IN_LATDIMS = J * C_IN
D = 32           # latent_dim / model_channels
NH = 4           # num_heads
HD = D // NH
MLP_H = int(D * 4.0)
NLAYERS = 2
OUT_CH = 3       # out_channels
FREQ = 256       # frequency_embedding_size
LN_EPS = 1e-6
BT = B * T
NO = J * OUT_CH
NEG = -1e30

# ------------------------- packed-slab layout constants ----------------------
KIN = CX * J + CJ * COND_IN      # 37 flattened input features (x + projected joints)
KIN_PAD = 64
NHBT = NH * BT                   # 64 : per-head key axis, heads stacked
MODP = 128                       # lane padding per adaLN modulation chunk
ADA_W_LANES = 6 * MODP           # per-layer modulation width (768)
OUT_PAD = 128

# bf16 weight slab rows (lane width 128)
R_TW1 = 0                        # (FREQ, D)
R_TW2 = R_TW1 + FREQ             # (D, D)
R_WIN = R_TW2 + D                # (KIN_PAD, D)   fused InputProcess(+cond) weight
R_ONES = R_WIN + KIN_PAD         # (NHBT, NHBT)   per-head block of ones (denominator)
R_WOUT = R_ONES + NHBT           # (D, OUT_PAD)   fused OutputProcess weight (padded)
R_LAYER0 = R_WOUT + D
LAYER_STRIDE = 5 * D + MLP_H     # wq, wk, wv, wproj, w1 (D rows each) + w2 (MLP_H rows)
W_ROWS = R_LAYER0 + NLAYERS * LAYER_STRIDE      # 1024

# f32 constant/bias slab rows (lane width 128)
C_POSB = 0                       # (BT, D)    pos_embed + in_b, tiled over batch
C_ABIAS = C_POSB + BT            # (BT, NHBT) block-diagonal attention bias
C_MASKV = C_ABIAS + BT           # (NHBT, D)  per-head mask for block-diag V
C_MASKKT = C_MASKV + NHBT        # (D, NHBT)  per-head mask for block-diag K^T
C_TB1 = C_MASKKT + D             # (1, D)
C_TB2 = C_TB1 + 1                # (1, D)
C_BOUT = C_TB2 + 1               # (1, OUT_PAD)
C_ADAB = C_BOUT + 1              # 6*NLAYERS rows of (1, D) adaLN biases
C_LBIAS0 = C_ADAB + 6 * NLAYERS + 1
C_LSTRIDE = 8                    # bq, bk, bv, bproj, bmlp1, bmlp2 (+2 pad) per layer
C_ROWS = C_LBIAS0 + NLAYERS * C_LSTRIDE         # 160


# ----------------------------- fused Pallas kernel ---------------------------
def _fused_forward_kernel(acts_ref, w_ref, adaw_ref, c_ref, o_ref):
    f32 = jnp.float32
    bf16 = jnp.bfloat16

    def wld(r0, rows, cols):                      # bf16 weight-slab view
        return w_ref[pl.ds(r0, rows), pl.ds(0, cols)]

    def cld(r0, rows, cols):                      # f32 constant-slab view
        return c_ref[pl.ds(r0, rows), pl.ds(0, cols)]

    def mm(a, w_bf):                              # bf16 MXU matmul, f32 accumulate
        return jnp.dot(a.astype(bf16), w_bf, preferred_element_type=f32)

    def ln(v):
        mu = jnp.mean(v, axis=-1, keepdims=True)
        var = jnp.mean((v - mu) ** 2, axis=-1, keepdims=True)
        return (v - mu) * jax.lax.rsqrt(var + LN_EPS)

    tf = acts_ref[:, pl.ds(0, FREQ)]              # (BT, 256) timestep features (per token)
    xin = acts_ref[:, pl.ds(FREQ, KIN_PAD)]       # (BT, 64)  flattened x + projected joints

    # ---- TimestepEmbedder MLP: Linear -> SiLU -> Linear (rows pre-broadcast) ----
    h = mm(tf, wld(R_TW1, FREQ, D)) + cld(C_TB1, 1, D)
    h = h * jax.nn.sigmoid(h)
    emb = mm(h, wld(R_TW2, D, D)) + cld(C_TB2, 1, D)
    cvecb = (emb * jax.nn.sigmoid(emb)).astype(bf16)   # SiLU of adaLN_modulation

    # ---- InputProcess (+ fused ConditionProjection) + pos_embed + in_b ----
    z = mm(xin, wld(R_WIN, KIN_PAD, D)) + cld(C_POSB, BT, D)

    onesb = wld(R_ONES, NHBT, NHBT)               # (64,64) bf16: 1 within head block
    maskv = cld(C_MASKV, NHBT, D)                 # (64,32) f32 0/1
    maskkt = cld(C_MASKKT, D, NHBT)               # (32,64) f32 0/1
    abias = cld(C_ABIAS, BT, NHBT)                # (16,64) f32: 0 / NEG block-diag

    for l in range(NLAYERS):
        base = R_LAYER0 + l * LAYER_STRIDE
        cb = C_LBIAS0 + l * C_LSTRIDE

        # fused adaLN modulation for this layer; chunks are 128-lane aligned
        modl = jnp.dot(cvecb, adaw_ref[l], preferred_element_type=f32)   # (BT, 768)

        def chunk(r, _modl=modl, _l=l):
            return (_modl[:, r * MODP: r * MODP + D]
                    + c_ref[pl.ds(C_ADAB + 6 * _l + r, 1), pl.ds(0, D)])

        # ---- attention branch (all heads fused along the lane dimension) ----
        xm = ln(z) * (1.0 + chunk(1)) + chunk(0)            # (BT, D)
        xmb = xm.astype(bf16)
        q = jnp.dot(xmb, wld(base + 0 * D, D, D), preferred_element_type=f32) \
            + cld(cb + 0, 1, D)                              # q already scaled by HD^-0.5
        k = jnp.dot(xmb, wld(base + 1 * D, D, D), preferred_element_type=f32) \
            + cld(cb + 1, 1, D)
        v = jnp.dot(xmb, wld(base + 2 * D, D, D), preferred_element_type=f32) \
            + cld(cb + 2, 1, D)

        # block-diagonal K^T (D, NH*BT) and V (NH*BT, D): one transpose per layer
        ktb = (jnp.concatenate([k.T] * NH, axis=1) * maskkt).astype(bf16)   # (32, 64)
        vbb = (jnp.concatenate([v] * NH, axis=0) * maskv).astype(bf16)      # (64, 32)

        s = mm(q, ktb) + abias                               # (BT, 64) per-head scores
        s = s - jnp.max(s, axis=-1, keepdims=True)           # shared row max (valid per head)
        p = jnp.exp(s)
        denom = mm(p, onesb)                                 # per-head sums, lane-broadcast
        pn = p * pl.reciprocal(denom, approx=True)
        oh = mm(pn, vbb)                                     # (BT, D) heads re-concatenated
        attn = mm(oh, wld(base + 3 * D, D, D)) + cld(cb + 3, 1, D)
        z = z + chunk(2) * attn

        # ---- MLP branch ----
        xm2 = ln(z) * (1.0 + chunk(4)) + chunk(3)
        h1 = mm(xm2, wld(base + 4 * D, D, MLP_H)) + cld(cb + 4, 1, MLP_H)
        h1 = jax.nn.gelu(h1, approximate=True)               # tanh GELU
        z = z + chunk(5) * (mm(h1, wld(base + 5 * D, MLP_H, D)) + cld(cb + 5, 1, D))

    # ---- OutputProcess: poseFinal + featsFinal fused, 128-lane padded store ----
    o_ref[...] = mm(z, wld(R_WOUT, D, OUT_PAD)) + cld(C_BOUT, 1, OUT_PAD)


def _full_spec(shape):
    zeros = (0,) * len(shape)
    return pl.BlockSpec(shape, lambda i, _z=zeros: _z)


# ----------------------------- glue (plain JAX) ------------------------------
def timestep_embedding(t, dim, max_period=10000):
    half = dim // 2
    freqs = jnp.exp(-math.log(max_period) *
                    jnp.arange(half, dtype=jnp.float32) / half)
    args = t[:, None].astype(jnp.float32) * freqs[None]
    return jnp.concatenate([jnp.cos(args), jnp.sin(args)], axis=-1)


def _pack_params(params):
    """Pack weights/biases/constants into 3 slabs (pure layout / linear algebra)."""
    f32 = jnp.float32
    qscale = HD ** -0.5

    def put(slab, r0, arr):
        arr = jnp.asarray(arr, f32)
        if arr.ndim == 1:
            arr = arr[None, :]
        return slab.at[r0:r0 + arr.shape[0], 0:arr.shape[1]].set(arr)

    # InputProcess weight with ConditionProjection folded in (flatten order j*C_IN + c).
    in_w = params['in_w']
    wx = [in_w[c::C_IN] for c in range(CX)]                              # (J, D) each
    wj = [params['cond_w'] @ in_w[(CX + cc)::C_IN] for cc in range(CJ)]  # (COND_IN, D)
    w_in = jnp.concatenate(wx + wj, axis=0)                              # (KIN, D)
    w_in = jnp.pad(w_in, ((0, KIN_PAD - KIN), (0, 0)))

    # OutputProcess: poseFinal then per-joint featsFinal == one composite linear.
    kb = jnp.kron(jnp.eye(J, dtype=f32), params['feat_w'])               # (J*C_IN, J*OUT_CH)
    wout = params['pose_w'] @ kb                                          # (D, NO)
    bout = params['pose_b'] @ kb + jnp.tile(params['feat_b'], J)          # (NO,)

    # Static masks / biases.
    r64 = jnp.arange(NHBT)
    cD = jnp.arange(D)
    mask_v = (r64[:, None] // BT == cD[None, :] // HD).astype(f32)        # (64, 32)
    mask_kt = mask_v.T                                                    # (32, 64)
    ones_b = (r64[:, None] // BT == r64[None, :] // BT).astype(f32)       # (64, 64)
    tok = jnp.arange(BT)
    abias = jnp.where(tok[:, None] // T == (r64[None, :] % BT) // T,
                      0.0, NEG).astype(f32)                               # (16, 64)
    posb = jnp.tile(params['pos_embed'][0] + params['in_b'][None, :], (B, 1))

    # ---- bf16 matmul-weight slab ----
    w = jnp.zeros((W_ROWS, 128), f32)
    w = put(w, R_TW1, params['t_w1'])
    w = put(w, R_TW2, params['t_w2'])
    w = put(w, R_WIN, w_in)
    w = put(w, R_ONES, ones_b)
    w = put(w, R_WOUT, jnp.pad(wout, ((0, 0), (0, OUT_PAD - NO))))

    # ---- f32 bias/constant slab ----
    c = jnp.zeros((C_ROWS, 128), f32)
    c = put(c, C_POSB, posb)
    c = put(c, C_ABIAS, abias)
    c = put(c, C_MASKV, mask_v)
    c = put(c, C_MASKKT, mask_kt)
    c = put(c, C_TB1, params['t_b1'])
    c = put(c, C_TB2, params['t_b2'])
    c = put(c, C_BOUT, jnp.pad(bout, (0, OUT_PAD - NO)))

    # ---- bf16 adaLN slab (chunks padded to 128 lanes each) ----
    adaw = jnp.zeros((NLAYERS, D, ADA_W_LANES), f32)

    for l, blk in enumerate(params['blocks']):
        base = R_LAYER0 + l * LAYER_STRIDE
        w = put(w, base + 0 * D, blk['qkv_w'][:, 0:D] * qscale)
        w = put(w, base + 1 * D, blk['qkv_w'][:, D:2 * D])
        w = put(w, base + 2 * D, blk['qkv_w'][:, 2 * D:3 * D])
        w = put(w, base + 3 * D, blk['proj_w'])
        w = put(w, base + 4 * D, blk['mlp_w1'])
        w = put(w, base + 5 * D, blk['mlp_w2'])
        cb = C_LBIAS0 + l * C_LSTRIDE
        c = put(c, cb + 0, blk['qkv_b'][0:D] * qscale)
        c = put(c, cb + 1, blk['qkv_b'][D:2 * D])
        c = put(c, cb + 2, blk['qkv_b'][2 * D:3 * D])
        c = put(c, cb + 3, blk['proj_b'])
        c = put(c, cb + 4, blk['mlp_b1'])
        c = put(c, cb + 5, blk['mlp_b2'])
        for r in range(6):
            adaw = adaw.at[l, :, r * MODP: r * MODP + D].set(
                blk['ada_w'][:, r * D:(r + 1) * D])
            c = put(c, C_ADAB + 6 * l + r, blk['ada_b'][r * D:(r + 1) * D])

    return w.astype(jnp.bfloat16), adaw.astype(jnp.bfloat16), c


def forward(params, x, timesteps, joints):
    """TransformerCondition.forward with add_cond=True, joint_cond=False."""
    f32 = jnp.float32
    wslab, adaw, cslab = _pack_params(params)

    # Activations: timestep features pre-broadcast to tokens + flattened inputs.
    tf = timestep_embedding(timesteps, FREQ)                  # (B, FREQ)
    tf_bt = jnp.repeat(tf.astype(f32), T, axis=0)             # (BT, FREQ)
    x2 = jnp.transpose(x, (0, 2, 1, 3)).reshape(BT, CX * J)
    j2 = jnp.transpose(joints, (0, 2, 1, 3)).reshape(BT, CJ * COND_IN)
    xin = jnp.concatenate([x2, j2], axis=1).astype(f32)       # (BT, KIN)
    xin = jnp.pad(xin, ((0, 0), (0, KIN_PAD - KIN)))
    acts = jnp.concatenate([tf_bt, xin], axis=1)              # (BT, FREQ + KIN_PAD)

    args = (acts, wslab, adaw, cslab)
    out2d = pl.pallas_call(
        _fused_forward_kernel,
        grid=(1,),
        in_specs=[_full_spec(a.shape) for a in args],
        out_specs=_full_spec((BT, OUT_PAD)),
        out_shape=jax.ShapeDtypeStruct((BT, OUT_PAD), f32),
        compiler_params=pltpu.CompilerParams(
            dimension_semantics=("arbitrary",)),
    )(*args)

    # (BT, OUT_PAD) -> (B, OUT_CH, T, J)
    return out2d[:, :NO].reshape(B, T, J, OUT_CH).transpose(0, 3, 1, 2)


# ----------------------------- pure-JAX reference ----------------------------
def ref_forward(params, x, timesteps, joints):
    hp = jax.lax.Precision.HIGHEST

    def lin(v, w, b=None):
        o = jnp.dot(v, w, precision=hp)
        return o if b is None else o + b

    def ln(v):
        mu = jnp.mean(v, -1, keepdims=True)
        var = jnp.mean((v - mu) ** 2, -1, keepdims=True)
        return (v - mu) / jnp.sqrt(var + LN_EPS)

    tf = timestep_embedding(timesteps, FREQ)
    h = lin(tf, params['t_w1'], params['t_b1'])
    h = h * jax.nn.sigmoid(h)
    emb = lin(h, params['t_w2'], params['t_b2'])

    cj = lin(joints, params['cond_w'])
    xx = jnp.concatenate([x, cj], axis=1)
    Bn, C, Tn, Jn = xx.shape
    z = lin(jnp.transpose(xx, (0, 2, 3, 1)).reshape(Bn, Tn, Jn * C),
            params['in_w'], params['in_b']) + params['pos_embed']

    for p in params['blocks']:
        sc = emb * jax.nn.sigmoid(emb)
        mod = lin(sc, p['ada_w'], p['ada_b'])
        sm, ss, gm, s2, c2, g2 = jnp.split(mod, 6, axis=1)
        xm = ln(z) * (1 + ss[:, None, :]) + sm[:, None, :]
        qkv = lin(xm, p['qkv_w'], p['qkv_b'])
        q, k, v = jnp.split(qkv, 3, axis=-1)
        q = q.reshape(Bn, Tn, NH, HD).transpose(0, 2, 1, 3)
        k = k.reshape(Bn, Tn, NH, HD).transpose(0, 2, 1, 3)
        v = v.reshape(Bn, Tn, NH, HD).transpose(0, 2, 1, 3)
        att = jnp.einsum('bhqd,bhkd->bhqk', q * (HD ** -0.5), k, precision=hp)
        att = jax.nn.softmax(att, axis=-1)
        ao = jnp.einsum('bhqk,bhkd->bhqd', att, v, precision=hp)
        ao = ao.transpose(0, 2, 1, 3).reshape(Bn, Tn, D)
        ao = lin(ao, p['proj_w'], p['proj_b'])
        z = z + gm[:, None, :] * ao
        xm2 = ln(z) * (1 + c2[:, None, :]) + s2[:, None, :]
        h1 = jax.nn.gelu(lin(xm2, p['mlp_w1'], p['mlp_b1']), approximate=True)
        z = z + g2[:, None, :] * lin(h1, p['mlp_w2'], p['mlp_b2'])

    o = lin(z, params['pose_w'], params['pose_b']).reshape(Bn, Tn, J, C_IN)
    o = lin(o, params['feat_w'], params['feat_b'])
    return jnp.transpose(o, (0, 3, 1, 2))


# ----------------------------- params & main ---------------------------------
def init_params(key):
    def nrm(k, shape, scale=0.05):
        return scale * jax.random.normal(k, shape, dtype=jnp.float32)

    keys = jax.random.split(key, 16 + NLAYERS)
    params = {
        't_w1': nrm(keys[0], (FREQ, D), 0.02),
        't_b1': jnp.zeros((D,), jnp.float32),
        't_w2': nrm(keys[1], (D, D), 0.02),
        't_b2': jnp.zeros((D,), jnp.float32),
        'cond_w': nrm(keys[2], (COND_IN, J)),          # ConditionProjection (no bias)
        'in_w': nrm(keys[3], (IN_LATDIMS, D)),
        'in_b': nrm(keys[4], (D,), 0.01),
        'pos_embed': nrm(keys[5], (1, T, D), 0.01),
        'pose_w': nrm(keys[6], (D, IN_LATDIMS)),
        'pose_b': nrm(keys[7], (IN_LATDIMS,), 0.01),
        'feat_w': nrm(keys[8], (C_IN, OUT_CH)),
        'feat_b': nrm(keys[9], (OUT_CH,), 0.01),
        'blocks': [],
    }
    for l in range(NLAYERS):
        bk = jax.random.split(keys[16 + l], 10)
        params['blocks'].append({
            'ada_w': nrm(bk[0], (D, 6 * D)),
            'ada_b': nrm(bk[1], (6 * D,), 0.01),
            'qkv_w': nrm(bk[2], (D, 3 * D)),
            'qkv_b': nrm(bk[3], (3 * D,), 0.01),
            'proj_w': nrm(bk[4], (D, D)),
            'proj_b': nrm(bk[5], (D,), 0.01),
            'mlp_w1': nrm(bk[6], (D, MLP_H)),
            'mlp_b1': nrm(bk[7], (MLP_H,), 0.01),
            'mlp_w2': nrm(bk[8], (MLP_H, D)),
            'mlp_b2': nrm(bk[9], (D,), 0.01),
        })
    return params


if __name__ == "__main__":
    key = jax.random.PRNGKey(0)
    kp, kx, kj = jax.random.split(key, 3)
    params = init_params(kp)

    x = jax.random.normal(kx, (B, CX, T, J), dtype=jnp.float32)
    joints = jax.random.normal(kj, (B, CJ, T, COND_IN), dtype=jnp.float32)
    timesteps = jnp.array([3.0, 17.0], dtype=jnp.float32)

    out = jax.jit(forward)(params, x, timesteps, joints)
    out = jax.block_until_ready(out)
    assert out.shape == (B, OUT_CH, T, J), out.shape

    ref = jax.block_until_ready(ref_forward(params, x, timesteps, joints))
    max_err = float(jnp.max(jnp.abs(out - ref)))
    assert max_err < 5e-3, f"mismatch vs reference: {max_err}"

    print("KERNEL_OK")
</pallas_src>

<mosaic_0001>
module attributes {stable_mosaic.version = 11 : i64} {
  func.func @_fused_forward_kernel(%arg0: i32, %arg1: memref<16x320xf32, #tpu.memory_space<vmem>>, %arg2: memref<1024x128xbf16, #tpu.memory_space<vmem>>, %arg3: memref<2x32x768xbf16, #tpu.memory_space<vmem>>, %arg4: memref<160x128xf32, #tpu.memory_space<vmem>>, %arg5: memref<16x128xf32, #tpu.memory_space<vmem>>) attributes {dimension_semantics = [#tpu.dimension_semantics<arbitrary>], iteration_bounds = array<i64: 1>, scalar_prefetch = 0 : i64, scratch_operands = 0 : i64, tpu.core_type = #tpu.core_type<tc>, window_params = [{pipeline_mode = #tpu.pipeline_mode<synchronous>, transform_indices = @transform_0, window_bounds = array<i64: 16, 320>}, {pipeline_mode = #tpu.pipeline_mode<synchronous>, transform_indices = @transform_1, window_bounds = array<i64: 1024, 128>}, {pipeline_mode = #tpu.pipeline_mode<synchronous>, transform_indices = @transform_2, window_bounds = array<i64: 2, 32, 768>}, {pipeline_mode = #tpu.pipeline_mode<synchronous>, transform_indices = @transform_3, window_bounds = array<i64: 160, 128>}, {pipeline_mode = #tpu.pipeline_mode<synchronous>, transform_indices = @transform_4, window_bounds = array<i64: 16, 128>}]} {
    %c0 = arith.constant 0 : index
    %c0_0 = arith.constant 0 : index
    %0 = vector.load %arg1[%c0, %c0_0] : memref<16x320xf32, #tpu.memory_space<vmem>>, vector<16x256xf32>
    %c0_1 = arith.constant 0 : index
    %c256 = arith.constant 256 : index
    %1 = vector.load %arg1[%c0_1, %c256] : memref<16x320xf32, #tpu.memory_space<vmem>>, vector<16x64xf32>
    %c0_2 = arith.constant 0 : index
    %c0_3 = arith.constant 0 : index
    %2 = vector.load %arg2[%c0_2, %c0_3] : memref<1024x128xbf16, #tpu.memory_space<vmem>>, vector<256x32xbf16>
    %3 = arith.truncf %0 : vector<16x256xf32> to vector<16x256xbf16>
    %cst = arith.constant dense<0.000000e+00> : vector<16x32xf32>
    %4 = tpu.matmul %3, %2, %cst {dimension_numbers = #tpu.dot_dimension_numbers<[1], [0], [0], [1], [0, 0, 1, 1], [], []>} : vector<16x256xbf16>, vector<256x32xbf16>, vector<16x32xf32> -> vector<16x32xf32>
    %c128 = arith.constant 128 : index
    %c0_4 = arith.constant 0 : index
    %5 = vector.load %arg4[%c128, %c0_4] : memref<160x128xf32, #tpu.memory_space<vmem>>, vector<1x32xf32>
    %6 = vector.broadcast %5 : vector<1x32xf32> to vector<16x32xf32>
    %7 = arith.addf %4, %6 : vector<16x32xf32>
    %8 = arith.negf %7 : vector<16x32xf32>
    %9 = math.exp %8 : vector<16x32xf32>
    %cst_5 = arith.constant 1.000000e+00 : f32
    %10 = vector.broadcast %cst_5 : f32 to vector<16x32xf32>
    %11 = arith.addf %10, %9 : vector<16x32xf32>
    %12 = arith.divf %10, %11 : vector<16x32xf32>
    %13 = arith.mulf %7, %12 : vector<16x32xf32>
    %c256_6 = arith.constant 256 : index
    %c0_7 = arith.constant 0 : index
    %14 = vector.load %arg2[%c256_6, %c0_7] : memref<1024x128xbf16, #tpu.memory_space<vmem>>, vector<32x32xbf16>
    %15 = arith.truncf %13 : vector<16x32xf32> to vector<16x32xbf16>
    %cst_8 = arith.constant dense<0.000000e+00> : vector<16x32xf32>
    %16 = tpu.matmul %15, %14, %cst_8 {dimension_numbers = #tpu.dot_dimension_numbers<[1], [0], [0], [1], [0, 0, 1, 1], [], []>} : vector<16x32xbf16>, vector<32x32xbf16>, vector<16x32xf32> -> vector<16x32xf32>
    %c129 = arith.constant 129 : index
    %c0_9 = arith.constant 0 : index
    %17 = vector.load %arg4[%c129, %c0_9] : memref<160x128xf32, #tpu.memory_space<vmem>>, vector<1x32xf32>
    %18 = vector.broadcast %17 : vector<1x32xf32> to vector<16x32xf32>
    %19 = arith.addf %16, %18 : vector<16x32xf32>
    %20 = arith.negf %19 : vector<16x32xf32>
    %21 = math.exp %20 : vector<16x32xf32>
    %cst_10 = arith.constant 1.000000e+00 : f32
    %22 = vector.broadcast %cst_10 : f32 to vector<16x32xf32>
    %23 = arith.addf %22, %21 : vector<16x32xf32>
    %24 = arith.divf %22, %23 : vector<16x32xf32>
    %25 = arith.mulf %19, %24 : vector<16x32xf32>
    %26 = arith.truncf %25 : vector<16x32xf32> to vector<16x32xbf16>
    %c288 = arith.constant 288 : index
    %c0_11 = arith.constant 0 : index
    %27 = vector.load %arg2[%c288, %c0_11] : memref<1024x128xbf16, #tpu.memory_space<vmem>>, vector<64x32xbf16>
    %28 = arith.truncf %1 : vector<16x64xf32> to vector<16x64xbf16>
    %cst_12 = arith.constant dense<0.000000e+00> : vector<16x32xf32>
    %29 = tpu.matmul %28, %27, %cst_12 {dimension_numbers = #tpu.dot_dimension_numbers<[1], [0], [0], [1], [0, 0, 1, 1], [], []>} : vector<16x64xbf16>, vector<64x32xbf16>, vector<16x32xf32> -> vector<16x32xf32>
    %c0_13 = arith.constant 0 : index
    %c0_14 = arith.constant 0 : index
    %30 = vector.load %arg4[%c0_13, %c0_14] : memref<160x128xf32, #tpu.memory_space<vmem>>, vector<16x32xf32>
    %31 = arith.addf %29, %30 : vector<16x32xf32>
    %c352 = arith.constant 352 : index
    %c0_15 = arith.constant 0 : index
    %32 = vector.load %arg2[%c352, %c0_15] : memref<1024x128xbf16, #tpu.memory_space<vmem>>, vector<64x64xbf16>
    %c32 = arith.constant 32 : index
    %c0_16 = arith.constant 0 : index
    %33 = vector.load %arg4[%c32, %c0_16] : memref<160x128xf32, #tpu.memory_space<vmem>>, vector<64x32xf32>
    %c96 = arith.constant 96 : index
    %c0_17 = arith.constant 0 : index
    %34 = vector.load %arg4[%c96, %c0_17] : memref<160x128xf32, #tpu.memory_space<vmem>>, vector<32x64xf32>
    %c16 = arith.constant 16 : index
    %c0_18 = arith.constant 0 : index
    %35 = vector.load %arg4[%c16, %c0_18] : memref<160x128xf32, #tpu.memory_space<vmem>>, vector<16x64xf32>
    %c0_19 = arith.constant 0 : index
    %c0_20 = arith.constant 0 : index
    %c0_21 = arith.constant 0 : index
    %36 = vector.load %arg3[%c0_19, %c0_20, %c0_21] : memref<2x32x768xbf16, #tpu.memory_space<vmem>>, vector<1x32x768xbf16>
    %37 = vector.shape_cast %36 : vector<1x32x768xbf16> to vector<32x768xbf16>
    %cst_22 = arith.constant dense<0.000000e+00> : vector<16x768xf32>
    %38 = tpu.matmul %26, %37, %cst_22 {dimension_numbers = #tpu.dot_dimension_numbers<[1], [0], [0], [1], [0, 0, 1, 1], [], []>} : vector<16x32xbf16>, vector<32x768xbf16>, vector<16x768xf32> -> vector<16x768xf32>
    %cst_23 = arith.constant dense<0.000000e+00> : vector<16xf32>
    %39 = vector.multi_reduction <add>, %31, %cst_23 [1] : vector<16x32xf32> to vector<16xf32>
    %40 = vector.shape_cast %39 : vector<16xf32> to vector<16x1xf32>
    %cst_24 = arith.constant 3.200000e+01 : f32
    %41 = vector.broadcast %cst_24 : f32 to vector<16x1xf32>
    %42 = arith.divf %40, %41 : vector<16x1xf32>
    %43 = vector.broadcast %42 : vector<16x1xf32> to vector<16x32xf32>
    %44 = arith.subf %31, %43 : vector<16x32xf32>
    %45 = arith.mulf %44, %44 : vector<16x32xf32>
    %cst_25 = arith.constant dense<0.000000e+00> : vector<16xf32>
    %46 = vector.multi_reduction <add>, %45, %cst_25 [1] : vector<16x32xf32> to vector<16xf32>
    %47 = vector.shape_cast %46 : vector<16xf32> to vector<16x1xf32>
    %cst_26 = arith.constant 3.200000e+01 : f32
    %48 = vector.broadcast %cst_26 : f32 to vector<16x1xf32>
    %49 = arith.divf %47, %48 : vector<16x1xf32>
    %50 = vector.broadcast %42 : vector<16x1xf32> to vector<16x32xf32>
    %51 = arith.subf %31, %50 : vector<16x32xf32>
    %cst_27 = arith.constant 9.99999997E-7 : f32
    %52 = vector.broadcast %cst_27 : f32 to vector<16x1xf32>
    %53 = arith.addf %49, %52 : vector<16x1xf32>
    %54 = math.rsqrt %53 : vector<16x1xf32>
    %55 = vector.broadcast %54 : vector<16x1xf32> to vector<16x32xf32>
    %56 = arith.mulf %51, %55 : vector<16x32xf32>
    %57 = vector.extract_strided_slice %38 {offsets = [0, 128], sizes = [16, 32], strides = [1, 1]} : vector<16x768xf32> to vector<16x32xf32>
    %c132 = arith.constant 132 : index
    %c0_28 = arith.constant 0 : index
    %58 = vector.load %arg4[%c132, %c0_28] : memref<160x128xf32, #tpu.memory_space<vmem>>, vector<1x32xf32>
    %59 = vector.broadcast %58 : vector<1x32xf32> to vector<16x32xf32>
    %60 = arith.addf %57, %59 : vector<16x32xf32>
    %cst_29 = arith.constant 1.000000e+00 : f32
    %61 = vector.broadcast %cst_29 : f32 to vector<16x32xf32>
    %62 = arith.addf %61, %60 : vector<16x32xf32>
    %63 = arith.mulf %56, %62 : vector<16x32xf32>
    %64 = vector.extract_strided_slice %38 {offsets = [0, 0], sizes = [16, 32], strides = [1, 1]} : vector<16x768xf32> to vector<16x32xf32>
    %c131 = arith.constant 131 : index
    %c0_30 = arith.constant 0 : index
    %65 = vector.load %arg4[%c131, %c0_30] : memref<160x128xf32, #tpu.memory_space<vmem>>, vector<1x32xf32>
    %66 = vector.broadcast %65 : vector<1x32xf32> to vector<16x32xf32>
    %67 = arith.addf %64, %66 : vector<16x32xf32>
    %68 = arith.addf %63, %67 : vector<16x32xf32>
    %69 = arith.truncf %68 : vector<16x32xf32> to vector<16x32xbf16>
    %c448 = arith.constant 448 : index
    %c0_31 = arith.constant 0 : index
    %70 = vector.load %arg2[%c448, %c0_31] : memref<1024x128xbf16, #tpu.memory_space<vmem>>, vector<32x32xbf16>
    %cst_32 = arith.constant dense<0.000000e+00> : vector<16x32xf32>
    %71 = tpu.matmul %69, %70, %cst_32 {dimension_numbers = #tpu.dot_dimension_numbers<[1], [0], [0], [1], [0, 0, 1, 1], [], []>} : vector<16x32xbf16>, vector<32x32xbf16>, vector<16x32xf32> -> vector<16x32xf32>
    %c144 = arith.constant 144 : index
    %c0_33 = arith.constant 0 : index
    %72 = vector.load %arg4[%c144, %c0_33] : memref<160x128xf32, #tpu.memory_space<vmem>>, vector<1x32xf32>
    %73 = vector.broadcast %72 : vector<1x32xf32> to vector<16x32xf32>
    %74 = arith.addf %71, %73 : vector<16x32xf32>
    %c480 = arith.constant 480 : index
    %c0_34 = arith.constant 0 : index
    %75 = vector.load %arg2[%c480, %c0_34] : memref<1024x128xbf16, #tpu.memory_space<vmem>>, vector<32x32xbf16>
    %cst_35 = arith.constant dense<0.000000e+00> : vector<16x32xf32>
    %76 = tpu.matmul %69, %75, %cst_35 {dimension_numbers = #tpu.dot_dimension_numbers<[1], [0], [0], [1], [0, 0, 1, 1], [], []>} : vector<16x32xbf16>, vector<32x32xbf16>, vector<16x32xf32> -> vector<16x32xf32>
    %c145 = arith.constant 145 : index
    %c0_36 = arith.constant 0 : index
    %77 = vector.load %arg4[%c145, %c0_36] : memref<160x128xf32, #tpu.memory_space<vmem>>, vector<1x32xf32>
    %78 = vector.broadcast %77 : vector<1x32xf32> to vector<16x32xf32>
    %79 = arith.addf %76, %78 : vector<16x32xf32>
    %c512 = arith.constant 512 : index
    %c0_37 = arith.constant 0 : index
    %80 = vector.load %arg2[%c512, %c0_37] : memref<1024x128xbf16, #tpu.memory_space<vmem>>, vector<32x32xbf16>
    %cst_38 = arith.constant dense<0.000000e+00> : vector<16x32xf32>
    %81 = tpu.matmul %69, %80, %cst_38 {dimension_numbers = #tpu.dot_dimension_numbers<[1], [0], [0], [1], [0, 0, 1, 1], [], []>} : vector<16x32xbf16>, vector<32x32xbf16>, vector<16x32xf32> -> vector<16x32xf32>
    %c146 = arith.constant 146 : index
    %c0_39 = arith.constant 0 : index
    %82 = vector.load %arg4[%c146, %c0_39] : memref<160x128xf32, #tpu.memory_space<vmem>>, vector<1x32xf32>
    %83 = vector.broadcast %82 : vector<1x32xf32> to vector<16x32xf32>
    %84 = arith.addf %81, %83 : vector<16x32xf32>
    %85 = tpu.transpose %79, [1, 0] : vector<16x32xf32> -> vector<32x16xf32>
    %86 = tpu.concatenate %85, %85, %85, %85 in 1 : vector<32x16xf32>, vector<32x16xf32>, vector<32x16xf32>, vector<32x16xf32> -> vector<32x64xf32>
    %87 = arith.mulf %86, %34 : vector<32x64xf32>
    %88 = arith.truncf %87 : vector<32x64xf32> to vector<32x64xbf16>
    %89 = tpu.concatenate %84, %84, %84, %84 in 0 : vector<16x32xf32>, vector<16x32xf32>, vector<16x32xf32>, vector<16x32xf32> -> vector<64x32xf32>
    %90 = arith.mulf %89, %33 : vector<64x32xf32>
    %91 = arith.truncf %90 : vector<64x32xf32> to vector<64x32xbf16>
    %92 = arith.truncf %74 : vector<16x32xf32> to vector<16x32xbf16>
    %cst_40 = arith.constant dense<0.000000e+00> : vector<16x64xf32>
    %93 = tpu.matmul %92, %88, %cst_40 {dimension_numbers = #tpu.dot_dimension_numbers<[1], [0], [0], [1], [0, 0, 1, 1], [], []>} : vector<16x32xbf16>, vector<32x64xbf16>, vector<16x64xf32> -> vector<16x64xf32>
    %94 = arith.addf %93, %35 : vector<16x64xf32>
    %cst_41 = arith.constant dense<0xFF800000> : vector<16xf32>
    %95 = vector.multi_reduction <maximumf>, %94, %cst_41 [1] : vector<16x64xf32> to vector<16xf32>
    %96 = vector.shape_cast %95 : vector<16xf32> to vector<16x1xf32>
    %97 = vector.broadcast %96 : vector<16x1xf32> to vector<16x64xf32>
    %98 = arith.subf %94, %97 : vector<16x64xf32>
    %99 = math.exp %98 : vector<16x64xf32>
    %100 = arith.truncf %99 : vector<16x64xf32> to vector<16x64xbf16>
    %cst_42 = arith.constant dense<0.000000e+00> : vector<16x64xf32>
    %101 = tpu.matmul %100, %32, %cst_42 {dimension_numbers = #tpu.dot_dimension_numbers<[1], [0], [0], [1], [0, 0, 1, 1], [], []>} : vector<16x64xbf16>, vector<64x64xbf16>, vector<16x64xf32> -> vector<16x64xf32>
    %102 = tpu.reciprocal %101 {approx = true} : vector<16x64xf32> -> vector<16x64xf32>
    %103 = arith.mulf %99, %102 : vector<16x64xf32>
    %104 = arith.truncf %103 : vector<16x64xf32> to vector<16x64xbf16>
    %cst_43 = arith.constant dense<0.000000e+00> : vector<16x32xf32>
    %105 = tpu.matmul %104, %91, %cst_43 {dimension_numbers = #tpu.dot_dimension_numbers<[1], [0], [0], [1], [0, 0, 1, 1], [], []>} : vector<16x64xbf16>, vector<64x32xbf16>, vector<16x32xf32> -> vector<16x32xf32>
    %c544 = arith.constant 544 : index
    %c0_44 = arith.constant 0 : index
    %106 = vector.load %arg2[%c544, %c0_44] : memref<1024x128xbf16, #tpu.memory_space<vmem>>, vector<32x32xbf16>
    %107 = arith.truncf %105 : vector<16x32xf32> to vector<16x32xbf16>
    %cst_45 = arith.constant dense<0.000000e+00> : vector<16x32xf32>
    %108 = tpu.matmul %107, %106, %cst_45 {dimension_numbers = #tpu.dot_dimension_numbers<[1], [0], [0], [1], [0, 0, 1, 1], [], []>} : vector<16x32xbf16>, vector<32x32xbf16>, vector<16x32xf32> -> vector<16x32xf32>
    %c147 = arith.constant 147 : index
    %c0_46 = arith.constant 0 : index
    %109 = vector.load %arg4[%c147, %c0_46] : memref<160x128xf32, #tpu.memory_space<vmem>>, vector<1x32xf32>
    %110 = vector.broadcast %109 : vector<1x32xf32> to vector<16x32xf32>
    %111 = arith.addf %108, %110 : vector<16x32xf32>
    %112 = vector.extract_strided_slice %38 {offsets = [0, 256], sizes = [16, 32], strides = [1, 1]} : vector<16x768xf32> to vector<16x32xf32>
    %c133 = arith.constant 133 : index
    %c0_47 = arith.constant 0 : index
    %113 = vector.load %arg4[%c133, %c0_47] : memref<160x128xf32, #tpu.memory_space<vmem>>, vector<1x32xf32>
    %114 = vector.broadcast %113 : vector<1x32xf32> to vector<16x32xf32>
    %115 = arith.addf %112, %114 : vector<16x32xf32>
    %116 = arith.mulf %115, %111 : vector<16x32xf32>
    %117 = arith.addf %31, %116 : vector<16x32xf32>
    %cst_48 = arith.constant dense<0.000000e+00> : vector<16xf32>
    %118 = vector.multi_reduction <add>, %117, %cst_48 [1] : vector<16x32xf32> to vector<16xf32>
    %119 = vector.shape_cast %118 : vector<16xf32> to vector<16x1xf32>
    %cst_49 = arith.constant 3.200000e+01 : f32
    %120 = vector.broadcast %cst_49 : f32 to vector<16x1xf32>
    %121 = arith.divf %119, %120 : vector<16x1xf32>
    %122 = vector.broadcast %121 : vector<16x1xf32> to vector<16x32xf32>
    %123 = arith.subf %117, %122 : vector<16x32xf32>
    %124 = arith.mulf %123, %123 : vector<16x32xf32>
    %cst_50 = arith.constant dense<0.000000e+00> : vector<16xf32>
    %125 = vector.multi_reduction <add>, %124, %cst_50 [1] : vector<16x32xf32> to vector<16xf32>
    %126 = vector.shape_cast %125 : vector<16xf32> to vector<16x1xf32>
    %cst_51 = arith.constant 3.200000e+01 : f32
    %127 = vector.broadcast %cst_51 : f32 to vector<16x1xf32>
    %128 = arith.divf %126, %127 : vector<16x1xf32>
    %129 = vector.broadcast %121 : vector<16x1xf32> to vector<16x32xf32>
    %130 = arith.subf %117, %129 : vector<16x32xf32>
    %cst_52 = arith.constant 9.99999997E-7 : f32
    %131 = vector.broadcast %cst_52 : f32 to vector<16x1xf32>
    %132 = arith.addf %128, %131 : vector<16x1xf32>
    %133 = math.rsqrt %132 : vector<16x1xf32>
    %134 = vector.broadcast %133 : vector<16x1xf32> to vector<16x32xf32>
    %135 = arith.mulf %130, %134 : vector<16x32xf32>
    %136 = vector.extract_strided_slice %38 {offsets = [0, 512], sizes = [16, 32], strides = [1, 1]} : vector<16x768xf32> to vector<16x32xf32>
    %c135 = arith.constant 135 : index
    %c0_53 = arith.constant 0 : index
    %137 = vector.load %arg4[%c135, %c0_53] : memref<160x128xf32, #tpu.memory_space<vmem>>, vector<1x32xf32>
    %138 = vector.broadcast %137 : vector<1x32xf32> to vector<16x32xf32>
    %139 = arith.addf %136, %138 : vector<16x32xf32>
    %cst_54 = arith.constant 1.000000e+00 : f32
    %140 = vector.broadcast %cst_54 : f32 to vector<16x32xf32>
    %141 = arith.addf %140, %139 : vector<16x32xf32>
    %142 = arith.mulf %135, %141 : vector<16x32xf32>
    %143 = vector.extract_strided_slice %38 {offsets = [0, 384], sizes = [16, 32], strides = [1, 1]} : vector<16x768xf32> to vector<16x32xf32>
    %c134 = arith.constant 134 : index
    %c0_55 = arith.constant 0 : index
    %144 = vector.load %arg4[%c134, %c0_55] : memref<160x128xf32, #tpu.memory_space<vmem>>, vector<1x32xf32>
    %145 = vector.broadcast %144 : vector<1x32xf32> to vector<16x32xf32>
    %146 = arith.addf %143, %145 : vector<16x32xf32>
    %147 = arith.addf %142, %146 : vector<16x32xf32>
    %c576 = arith.constant 576 : index
    %c0_56 = arith.constant 0 : index
    %148 = vector.load %arg2[%c576, %c0_56] : memref<1024x128xbf16, #tpu.memory_space<vmem>>, vector<32x128xbf16>
    %149 = arith.truncf %147 : vector<16x32xf32> to vector<16x32xbf16>
    %cst_57 = arith.constant dense<0.000000e+00> : vector<16x128xf32>
    %150 = tpu.matmul %149, %148, %cst_57 {dimension_numbers = #tpu.dot_dimension_numbers<[1], [0], [0], [1], [0, 0, 1, 1], [], []>} : vector<16x32xbf16>, vector<32x128xbf16>, vector<16x128xf32> -> vector<16x128xf32>
    %c148 = arith.constant 148 : index
    %c0_58 = arith.constant 0 : index
    %151 = vector.load %arg4[%c148, %c0_58] : memref<160x128xf32, #tpu.memory_space<vmem>>, vector<1x128xf32>
    %152 = vector.broadcast %151 : vector<1x128xf32> to vector<16x128xf32>
    %153 = arith.addf %150, %152 : vector<16x128xf32>
    %154 = arith.mulf %153, %153 : vector<16x128xf32>
    %155 = arith.mulf %153, %154 : vector<16x128xf32>
    %cst_59 = arith.constant 4.471500e-02 : f32
    %156 = vector.broadcast %cst_59 : f32 to vector<16x128xf32>
    %157 = arith.mulf %156, %155 : vector<16x128xf32>
    %158 = arith.addf %153, %157 : vector<16x128xf32>
    %cst_60 = arith.constant 0.797884583 : f32
    %159 = vector.broadcast %cst_60 : f32 to vector<16x128xf32>
    %160 = arith.mulf %159, %158 : vector<16x128xf32>
    %161 = math.tanh %160 : vector<16x128xf32>
    %cst_61 = arith.constant 1.000000e+00 : f32
    %162 = vector.broadcast %cst_61 : f32 to vector<16x128xf32>
    %163 = arith.addf %162, %161 : vector<16x128xf32>
    %cst_62 = arith.constant 5.000000e-01 : f32
    %164 = vector.broadcast %cst_62 : f32 to vector<16x128xf32>
    %165 = arith.mulf %164, %163 : vector<16x128xf32>
    %166 = arith.mulf %153, %165 : vector<16x128xf32>
    %167 = vector.extract_strided_slice %38 {offsets = [0, 640], sizes = [16, 32], strides = [1, 1]} : vector<16x768xf32> to vector<16x32xf32>
    %c136 = arith.constant 136 : index
    %c0_63 = arith.constant 0 : index
    %168 = vector.load %arg4[%c136, %c0_63] : memref<160x128xf32, #tpu.memory_space<vmem>>, vector<1x32xf32>
    %169 = vector.broadcast %168 : vector<1x32xf32> to vector<16x32xf32>
    %170 = arith.addf %167, %169 : vector<16x32xf32>
    %c608 = arith.constant 608 : index
    %c0_64 = arith.constant 0 : index
    %171 = vector.load %arg2[%c608, %c0_64] : memref<1024x128xbf16, #tpu.memory_space<vmem>>, vector<128x32xbf16>
    %172 = arith.truncf %166 : vector<16x128xf32> to vector<16x128xbf16>
    %cst_65 = arith.constant dense<0.000000e+00> : vector<16x32xf32>
    %173 = tpu.matmul %172, %171, %cst_65 {dimension_numbers = #tpu.dot_dimension_numbers<[1], [0], [0], [1], [0, 0, 1, 1], [], []>} : vector<16x128xbf16>, vector<128x32xbf16>, vector<16x32xf32> -> vector<16x32xf32>
    %c149 = arith.constant 149 : index
    %c0_66 = arith.constant 0 : index
    %174 = vector.load %arg4[%c149, %c0_66] : memref<160x128xf32, #tpu.memory_space<vmem>>, vector<1x32xf32>
    %175 = vector.broadcast %174 : vector<1x32xf32> to vector<16x32xf32>
    %176 = arith.addf %173, %175 : vector<16x32xf32>
    %177 = arith.mulf %170, %176 : vector<16x32xf32>
    %178 = arith.addf %117, %177 : vector<16x32xf32>
    %c1 = arith.constant 1 : index
    %c0_67 = arith.constant 0 : index
    %c0_68 = arith.constant 0 : index
    %179 = vector.load %arg3[%c1, %c0_67, %c0_68] : memref<2x32x768xbf16, #tpu.memory_space<vmem>>, vector<1x32x768xbf16>
    %180 = vector.shape_cast %179 : vector<1x32x768xbf16> to vector<32x768xbf16>
    %cst_69 = arith.constant dense<0.000000e+00> : vector<16x768xf32>
    %181 = tpu.matmul %26, %180, %cst_69 {dimension_numbers = #tpu.dot_dimension_numbers<[1], [0], [0], [1], [0, 0, 1, 1], [], []>} : vector<16x32xbf16>, vector<32x768xbf16>, vector<16x768xf32> -> vector<16x768xf32>
    %cst_70 = arith.constant dense<0.000000e+00> : vector<16xf32>
    %182 = vector.multi_reduction <add>, %178, %cst_70 [1] : vector<16x32xf32> to vector<16xf32>
    %183 = vector.shape_cast %182 : vector<16xf32> to vector<16x1xf32>
    %cst_71 = arith.constant 3.200000e+01 : f32
    %184 = vector.broadcast %cst_71 : f32 to vector<16x1xf32>
    %185 = arith.divf %183, %184 : vector<16x1xf32>
    %186 = vector.broadcast %185 : vector<16x1xf32> to vector<16x32xf32>
    %187 = arith.subf %178, %186 : vector<16x32xf32>
    %188 = arith.mulf %187, %187 : vector<16x32xf32>
    %cst_72 = arith.constant dense<0.000000e+00> : vector<16xf32>
    %189 = vector.multi_reduction <add>, %188, %cst_72 [1] : vector<16x32xf32> to vector<16xf32>
    %190 = vector.shape_cast %189 : vector<16xf32> to vector<16x1xf32>
    %cst_73 = arith.constant 3.200000e+01 : f32
    %191 = vector.broadcast %cst_73 : f32 to vector<16x1xf32>
    %192 = arith.divf %190, %191 : vector<16x1xf32>
    %193 = vector.broadcast %185 : vector<16x1xf32> to vector<16x32xf32>
    %194 = arith.subf %178, %193 : vector<16x32xf32>
    %cst_74 = arith.constant 9.99999997E-7 : f32
    %195 = vector.broadcast %cst_74 : f32 to vector<16x1xf32>
    %196 = arith.addf %192, %195 : vector<16x1xf32>
    %197 = math.rsqrt %196 : vector<16x1xf32>
    %198 = vector.broadcast %197 : vector<16x1xf32> to vector<16x32xf32>
    %199 = arith.mulf %194, %198 : vector<16x32xf32>
    %200 = vector.extract_strided_slice %181 {offsets = [0, 128], sizes = [16, 32], strides = [1, 1]} : vector<16x768xf32> to vector<16x32xf32>
    %c138 = arith.constant 138 : index
    %c0_75 = arith.constant 0 : index
    %201 = vector.load %arg4[%c138, %c0_75] : memref<160x128xf32, #tpu.memory_space<vmem>>, vector<1x32xf32>
    %202 = vector.broadcast %201 : vector<1x32xf32> to vector<16x32xf32>
    %203 = arith.addf %200, %202 : vector<16x32xf32>
    %cst_76 = arith.constant 1.000000e+00 : f32
    %204 = vector.broadcast %cst_76 : f32 to vector<16x32xf32>
    %205 = arith.addf %204, %203 : vector<16x32xf32>
    %206 = arith.mulf %199, %205 : vector<16x32xf32>
    %207 = vector.extract_strided_slice %181 {offsets = [0, 0], sizes = [16, 32], strides = [1, 1]} : vector<16x768xf32> to vector<16x32xf32>
    %c137 = arith.constant 137 : index
    %c0_77 = arith.constant 0 : index
    %208 = vector.load %arg4[%c137, %c0_77] : memref<160x128xf32, #tpu.memory_space<vmem>>, vector<1x32xf32>
    %209 = vector.broadcast %208 : vector<1x32xf32> to vector<16x32xf32>
    %210 = arith.addf %207, %209 : vector<16x32xf32>
    %211 = arith.addf %206, %210 : vector<16x32xf32>
    %212 = arith.truncf %211 : vector<16x32xf32> to vector<16x32xbf16>
    %c736 = arith.constant 736 : index
    %c0_78 = arith.constant 0 : index
    %213 = vector.load %arg2[%c736, %c0_78] : memref<1024x128xbf16, #tpu.memory_space<vmem>>, vector<32x32xbf16>
    %cst_79 = arith.constant dense<0.000000e+00> : vector<16x32xf32>
    %214 = tpu.matmul %212, %213, %cst_79 {dimension_numbers = #tpu.dot_dimension_numbers<[1], [0], [0], [1], [0, 0, 1, 1], [], []>} : vector<16x32xbf16>, vector<32x32xbf16>, vector<16x32xf32> -> vector<16x32xf32>
    %c152 = arith.constant 152 : index
    %c0_80 = arith.constant 0 : index
    %215 = vector.load %arg4[%c152, %c0_80] : memref<160x128xf32, #tpu.memory_space<vmem>>, vector<1x32xf32>
    %216 = vector.broadcast %215 : vector<1x32xf32> to vector<16x32xf32>
    %217 = arith.addf %214, %216 : vector<16x32xf32>
    %c768 = arith.constant 768 : index
    %c0_81 = arith.constant 0 : index
    %218 = vector.load %arg2[%c768, %c0_81] : memref<1024x128xbf16, #tpu.memory_space<vmem>>, vector<32x32xbf16>
    %cst_82 = arith.constant dense<0.000000e+00> : vector<16x32xf32>
    %219 = tpu.matmul %212, %218, %cst_82 {dimension_numbers = #tpu.dot_dimension_numbers<[1], [0], [0], [1], [0, 0, 1, 1], [], []>} : vector<16x32xbf16>, vector<32x32xbf16>, vector<16x32xf32> -> vector<16x32xf32>
    %c153 = arith.constant 153 : index
    %c0_83 = arith.constant 0 : index
    %220 = vector.load %arg4[%c153, %c0_83] : memref<160x128xf32, #tpu.memory_space<vmem>>, vector<1x32xf32>
    %221 = vector.broadcast %220 : vector<1x32xf32> to vector<16x32xf32>
    %222 = arith.addf %219, %221 : vector<16x32xf32>
    %c800 = arith.constant 800 : index
    %c0_84 = arith.constant 0 : index
    %223 = vector.load %arg2[%c800, %c0_84] : memref<1024x128xbf16, #tpu.memory_space<vmem>>, vector<32x32xbf16>
    %cst_85 = arith.constant dense<0.000000e+00> : vector<16x32xf32>
    %224 = tpu.matmul %212, %223, %cst_85 {dimension_numbers = #tpu.dot_dimension_numbers<[1], [0], [0], [1], [0, 0, 1, 1], [], []>} : vector<16x32xbf16>, vector<32x32xbf16>, vector<16x32xf32> -> vector<16x32xf32>
    %c154 = arith.constant 154 : index
    %c0_86 = arith.constant 0 : index
    %225 = vector.load %arg4[%c154, %c0_86] : memref<160x128xf32, #tpu.memory_space<vmem>>, vector<1x32xf32>
    %226 = vector.broadcast %225 : vector<1x32xf32> to vector<16x32xf32>
    %227 = arith.addf %224, %226 : vector<16x32xf32>
    %228 = tpu.transpose %222, [1, 0] : vector<16x32xf32> -> vector<32x16xf32>
    %229 = tpu.concatenate %228, %228, %228, %228 in 1 : vector<32x16xf32>, vector<32x16xf32>, vector<32x16xf32>, vector<32x16xf32> -> vector<32x64xf32>
    %230 = arith.mulf %229, %34 : vector<32x64xf32>
    %231 = arith.truncf %230 : vector<32x64xf32> to vector<32x64xbf16>
    %232 = tpu.concatenate %227, %227, %227, %227 in 0 : vector<16x32xf32>, vector<16x32xf32>, vector<16x32xf32>, vector<16x32xf32> -> vector<64x32xf32>
    %233 = arith.mulf %232, %33 : vector<64x32xf32>
    %234 = arith.truncf %233 : vector<64x32xf32> to vector<64x32xbf16>
    %235 = arith.truncf %217 : vector<16x32xf32> to vector<16x32xbf16>
    %cst_87 = arith.constant dense<0.000000e+00> : vector<16x64xf32>
    %236 = tpu.matmul %235, %231, %cst_87 {dimension_numbers = #tpu.dot_dimension_numbers<[1], [0], [0], [1], [0, 0, 1, 1], [], []>} : vector<16x32xbf16>, vector<32x64xbf16>, vector<16x64xf32> -> vector<16x64xf32>
    %237 = arith.addf %236, %35 : vector<16x64xf32>
    %cst_88 = arith.constant dense<0xFF800000> : vector<16xf32>
    %238 = vector.multi_reduction <maximumf>, %237, %cst_88 [1] : vector<16x64xf32> to vector<16xf32>
    %239 = vector.shape_cast %238 : vector<16xf32> to vector<16x1xf32>
    %240 = vector.broadcast %239 : vector<16x1xf32> to vector<16x64xf32>
    %241 = arith.subf %237, %240 : vector<16x64xf32>
    %242 = math.exp %241 : vector<16x64xf32>
    %243 = arith.truncf %242 : vector<16x64xf32> to vector<16x64xbf16>
    %cst_89 = arith.constant dense<0.000000e+00> : vector<16x64xf32>
    %244 = tpu.matmul %243, %32, %cst_89 {dimension_numbers = #tpu.dot_dimension_numbers<[1], [0], [0], [1], [0, 0, 1, 1], [], []>} : vector<16x64xbf16>, vector<64x64xbf16>, vector<16x64xf32> -> vector<16x64xf32>
    %245 = tpu.reciprocal %244 {approx = true} : vector<16x64xf32> -> vector<16x64xf32>
    %246 = arith.mulf %242, %245 : vector<16x64xf32>
    %247 = arith.truncf %246 : vector<16x64xf32> to vector<16x64xbf16>
    %cst_90 = arith.constant dense<0.000000e+00> : vector<16x32xf32>
    %248 = tpu.matmul %247, %234, %cst_90 {dimension_numbers = #tpu.dot_dimension_numbers<[1], [0], [0], [1], [0, 0, 1, 1], [], []>} : vector<16x64xbf16>, vector<64x32xbf16>, vector<16x32xf32> -> vector<16x32xf32>
    %c832 = arith.constant 832 : index
    %c0_91 = arith.constant 0 : index
    %249 = vector.load %arg2[%c832, %c0_91] : memref<1024x128xbf16, #tpu.memory_space<vmem>>, vector<32x32xbf16>
    %250 = arith.truncf %248 : vector<16x32xf32> to vector<16x32xbf16>
    %cst_92 = arith.constant dense<0.000000e+00> : vector<16x32xf32>
    %251 = tpu.matmul %250, %249, %cst_92 {dimension_numbers = #tpu.dot_dimension_numbers<[1], [0], [0], [1], [0, 0, 1, 1], [], []>} : vector<16x32xbf16>, vector<32x32xbf16>, vector<16x32xf32> -> vector<16x32xf32>
    %c155 = arith.constant 155 : index
    %c0_93 = arith.constant 0 : index
    %252 = vector.load %arg4[%c155, %c0_93] : memref<160x128xf32, #tpu.memory_space<vmem>>, vector<1x32xf32>
    %253 = vector.broadcast %252 : vector<1x32xf32> to vector<16x32xf32>
    %254 = arith.addf %251, %253 : vector<16x32xf32>
    %255 = vector.extract_strided_slice %181 {offsets = [0, 256], sizes = [16, 32], strides = [1, 1]} : vector<16x768xf32> to vector<16x32xf32>
    %c139 = arith.constant 139 : index
    %c0_94 = arith.constant 0 : index
    %256 = vector.load %arg4[%c139, %c0_94] : memref<160x128xf32, #tpu.memory_space<vmem>>, vector<1x32xf32>
    %257 = vector.broadcast %256 : vector<1x32xf32> to vector<16x32xf32>
    %258 = arith.addf %255, %257 : vector<16x32xf32>
    %259 = arith.mulf %258, %254 : vector<16x32xf32>
    %260 = arith.addf %178, %259 : vector<16x32xf32>
    %cst_95 = arith.constant dense<0.000000e+00> : vector<16xf32>
    %261 = vector.multi_reduction <add>, %260, %cst_95 [1] : vector<16x32xf32> to vector<16xf32>
    %262 = vector.shape_cast %261 : vector<16xf32> to vector<16x1xf32>
    %cst_96 = arith.constant 3.200000e+01 : f32
    %263 = vector.broadcast %cst_96 : f32 to vector<16x1xf32>
    %264 = arith.divf %262, %263 : vector<16x1xf32>
    %265 = vector.broadcast %264 : vector<16x1xf32> to vector<16x32xf32>
    %266 = arith.subf %260, %265 : vector<16x32xf32>
    %267 = arith.mulf %266, %266 : vector<16x32xf32>
    %cst_97 = arith.constant dense<0.000000e+00> : vector<16xf32>
    %268 = vector.multi_reduction <add>, %267, %cst_97 [1] : vector<16x32xf32> to vector<16xf32>
    %269 = vector.shape_cast %268 : vector<16xf32> to vector<16x1xf32>
    %cst_98 = arith.constant 3.200000e+01 : f32
    %270 = vector.broadcast %cst_98 : f32 to vector<16x1xf32>
    %271 = arith.divf %269, %270 : vector<16x1xf32>
    %272 = vector.broadcast %264 : vector<16x1xf32> to vector<16x32xf32>
    %273 = arith.subf %260, %272 : vector<16x32xf32>
    %cst_99 = arith.constant 9.99999997E-7 : f32
    %274 = vector.broadcast %cst_99 : f32 to vector<16x1xf32>
    %275 = arith.addf %271, %274 : vector<16x1xf32>
    %276 = math.rsqrt %275 : vector<16x1xf32>
    %277 = vector.broadcast %276 : vector<16x1xf32> to vector<16x32xf32>
    %278 = arith.mulf %273, %277 : vector<16x32xf32>
    %279 = vector.extract_strided_slice %181 {offsets = [0, 512], sizes = [16, 32], strides = [1, 1]} : vector<16x768xf32> to vector<16x32xf32>
    %c141 = arith.constant 141 : index
    %c0_100 = arith.constant 0 : index
    %280 = vector.load %arg4[%c141, %c0_100] : memref<160x128xf32, #tpu.memory_space<vmem>>, vector<1x32xf32>
    %281 = vector.broadcast %280 : vector<1x32xf32> to vector<16x32xf32>
    %282 = arith.addf %279, %281 : vector<16x32xf32>
    %cst_101 = arith.constant 1.000000e+00 : f32
    %283 = vector.broadcast %cst_101 : f32 to vector<16x32xf32>
    %284 = arith.addf %283, %282 : vector<16x32xf32>
    %285 = arith.mulf %278, %284 : vector<16x32xf32>
    %286 = vector.extract_strided_slice %181 {offsets = [0, 384], sizes = [16, 32], strides = [1, 1]} : vector<16x768xf32> to vector<16x32xf32>
    %c140 = arith.constant 140 : index
    %c0_102 = arith.constant 0 : index
    %287 = vector.load %arg4[%c140, %c0_102] : memref<160x128xf32, #tpu.memory_space<vmem>>, vector<1x32xf32>
    %288 = vector.broadcast %287 : vector<1x32xf32> to vector<16x32xf32>
    %289 = arith.addf %286, %288 : vector<16x32xf32>
    %290 = arith.addf %285, %289 : vector<16x32xf32>
    %c864 = arith.constant 864 : index
    %c0_103 = arith.constant 0 : index
    %291 = vector.load %arg2[%c864, %c0_103] : memref<1024x128xbf16, #tpu.memory_space<vmem>>, vector<32x128xbf16>
    %292 = arith.truncf %290 : vector<16x32xf32> to vector<16x32xbf16>
    %cst_104 = arith.constant dense<0.000000e+00> : vector<16x128xf32>
    %293 = tpu.matmul %292, %291, %cst_104 {dimension_numbers = #tpu.dot_dimension_numbers<[1], [0], [0], [1], [0, 0, 1, 1], [], []>} : vector<16x32xbf16>, vector<32x128xbf16>, vector<16x128xf32> -> vector<16x128xf32>
    %c156 = arith.constant 156 : index
    %c0_105 = arith.constant 0 : index
    %294 = vector.load %arg4[%c156, %c0_105] : memref<160x128xf32, #tpu.memory_space<vmem>>, vector<1x128xf32>
    %295 = vector.broadcast %294 : vector<1x128xf32> to vector<16x128xf32>
    %296 = arith.addf %293, %295 : vector<16x128xf32>
    %297 = arith.mulf %296, %296 : vector<16x128xf32>
    %298 = arith.mulf %296, %297 : vector<16x128xf32>
    %cst_106 = arith.constant 4.471500e-02 : f32
    %299 = vector.broadcast %cst_106 : f32 to vector<16x128xf32>
    %300 = arith.mulf %299, %298 : vector<16x128xf32>
    %301 = arith.addf %296, %300 : vector<16x128xf32>
    %cst_107 = arith.constant 0.797884583 : f32
    %302 = vector.broadcast %cst_107 : f32 to vector<16x128xf32>
    %303 = arith.mulf %302, %301 : vector<16x128xf32>
    %304 = math.tanh %303 : vector<16x128xf32>
    %cst_108 = arith.constant 1.000000e+00 : f32
    %305 = vector.broadcast %cst_108 : f32 to vector<16x128xf32>
    %306 = arith.addf %305, %304 : vector<16x128xf32>
    %cst_109 = arith.constant 5.000000e-01 : f32
    %307 = vector.broadcast %cst_109 : f32 to vector<16x128xf32>
    %308 = arith.mulf %307, %306 : vector<16x128xf32>
    %309 = arith.mulf %296, %308 : vector<16x128xf32>
    %310 = vector.extract_strided_slice %181 {offsets = [0, 640], sizes = [16, 32], strides = [1, 1]} : vector<16x768xf32> to vector<16x32xf32>
    %c142 = arith.constant 142 : index
    %c0_110 = arith.constant 0 : index
    %311 = vector.load %arg4[%c142, %c0_110] : memref<160x128xf32, #tpu.memory_space<vmem>>, vector<1x32xf32>
    %312 = vector.broadcast %311 : vector<1x32xf32> to vector<16x32xf32>
    %313 = arith.addf %310, %312 : vector<16x32xf32>
    %c896 = arith.constant 896 : index
    %c0_111 = arith.constant 0 : index
    %314 = vector.load %arg2[%c896, %c0_111] : memref<1024x128xbf16, #tpu.memory_space<vmem>>, vector<128x32xbf16>
    %315 = arith.truncf %309 : vector<16x128xf32> to vector<16x128xbf16>
    %cst_112 = arith.constant dense<0.000000e+00> : vector<16x32xf32>
    %316 = tpu.matmul %315, %314, %cst_112 {dimension_numbers = #tpu.dot_dimension_numbers<[1], [0], [0], [1], [0, 0, 1, 1], [], []>} : vector<16x128xbf16>, vector<128x32xbf16>, vector<16x32xf32> -> vector<16x32xf32>
    %c157 = arith.constant 157 : index
    %c0_113 = arith.constant 0 : index
    %317 = vector.load %arg4[%c157, %c0_113] : memref<160x128xf32, #tpu.memory_space<vmem>>, vector<1x32xf32>
    %318 = vector.broadcast %317 : vector<1x32xf32> to vector<16x32xf32>
    %319 = arith.addf %316, %318 : vector<16x32xf32>
    %320 = arith.mulf %313, %319 : vector<16x32xf32>
    %321 = arith.addf %260, %320 : vector<16x32xf32>
    %c416 = arith.constant 416 : index
    %c0_114 = arith.constant 0 : index
    %322 = vector.load %arg2[%c416, %c0_114] : memref<1024x128xbf16, #tpu.memory_space<vmem>>, vector<32x128xbf16>
    %323 = arith.truncf %321 : vector<16x32xf32> to vector<16x32xbf16>
    %cst_115 = arith.constant dense<0.000000e+00> : vector<16x128xf32>
    %324 = tpu.matmul %323, %322, %cst_115 {dimension_numbers = #tpu.dot_dimension_numbers<[1], [0], [0], [1], [0, 0, 1, 1], [], []>} : vector<16x32xbf16>, vector<32x128xbf16>, vector<16x128xf32> -> vector<16x128xf32>
    %c130 = arith.constant 130 : index
    %c0_116 = arith.constant 0 : index
    %325 = vector.load %arg4[%c130, %c0_116] : memref<160x128xf32, #tpu.memory_space<vmem>>, vector<1x128xf32>
    %326 = vector.broadcast %325 : vector<1x128xf32> to vector<16x128xf32>
    %327 = arith.addf %324, %326 : vector<16x128xf32>
    %c0_117 = arith.constant 0 : index
    %c0_118 = arith.constant 0 : index
    %328 = vector.load %arg5[%c0_117, %c0_118] : memref<16x128xf32, #tpu.memory_space<vmem>>, vector<16x128xf32>
    tpu.vector_store %arg5[%c0_117, %c0_118], %327 {strides = array<i32>} : memref<16x128xf32, #tpu.memory_space<vmem>>, vector<16x128xf32>,
    return
  }
  func.func @transform_0(%arg0: i32) -> (i32, i32) {
    %c0_i32 = arith.constant 0 : i32
    %c0_i32_0 = arith.constant 0 : i32
    %c0_i32_1 = arith.constant 0 : i32
    return %c0_i32, %c0_i32_0 : i32, i32
  }
  func.func @transform_1(%arg0: i32) -> (i32, i32) {
    %c0_i32 = arith.constant 0 : i32
    %c0_i32_0 = arith.constant 0 : i32
    %c0_i32_1 = arith.constant 0 : i32
    return %c0_i32, %c0_i32_0 : i32, i32
  }
  func.func @transform_2(%arg0: i32) -> (i32, i32, i32) {
    %c0_i32 = arith.constant 0 : i32
    %c0_i32_0 = arith.constant 0 : i32
    %c0_i32_1 = arith.constant 0 : i32
    %c0_i32_2 = arith.constant 0 : i32
    return %c0_i32, %c0_i32_0, %c0_i32_1 : i32, i32, i32
  }
  func.func @transform_3(%arg0: i32) -> (i32, i32) {
    %c0_i32 = arith.constant 0 : i32
    %c0_i32_0 = arith.constant 0 : i32
    %c0_i32_1 = arith.constant 0 : i32
    return %c0_i32, %c0_i32_0 : i32, i32
  }
  func.func @transform_4(%arg0: i32) -> (i32, i32) {
    %c0_i32 = arith.constant 0 : i32
    %c0_i32_0 = arith.constant 0 : i32
    %c0_i32_1 = arith.constant 0 : i32
    return %c0_i32, %c0_i32_0 : i32, i32
  }
}

</mosaic_0001>

<bundles_post_ra>
// kernel: tile.13
= control target key start
LH: loop header
LB: loop body
LE: loop exit
PB: predicated region body
PF: predicated region fallthrough
CT: control target
= control target key end

     0   :  { %s28_s0 = inlined_call_operand.vmem [shape: f32[3], index: 0, kind: input, shape index: {}]   ;;  %s29_s1 = inlined_call_operand.vmem [shape: f32[16,3], index: 1, kind: output, shape index: {}]  }
   0x1   :  { %v4_v0 = vld [vmem:[%s28_s0] ss:$0 sm:$0xff] }
   0x2   :  { %5 = vst [vmem:[%s29_s1] sm:$0xff] %v4_v0  ;;  %8 = vst [vmem:[%s29_s1 + $0x8] sm:$0xff] %v4_v0 }

// kernel: tile.14
= control target key start
LH: loop header
LB: loop body
LE: loop exit
PB: predicated region body
PF: predicated region fallthrough
CT: control target
= control target key end

     0   :  { %s131_s10 = smov 45   ;;  %s132_s11 = smov 39   ;;  %vm3_vm0 = vcmask 23552   ;;  %vm9_vm1 = vcmask 392552   ;;  %vm15_vm2 = vcmask 367952   ;;  %vm21_vm3 = vcmask 343352   ;;  %s207_s0 = inlined_call_operand.vmem [shape: f32[16,3], index: 0, kind: input, shape index: {}]   ;;  %s208_s1 = inlined_call_operand.vmem [shape: f32[48], index: 1, kind: output, shape index: {}]  }
   0x1   :  { %v101_v0 = vld [vmem:[%s207_s0 + $0xf] sm:$0x1]   ;;  %v103_v1 = vld [vmem:[%s207_s0 + $0xd] sm:$0x1]   ;;  %v102_v2 = vld [vmem:[%s207_s0 + $0xe] sm:$0x1]  }
   0x2   :  { %7 = vrot.lane.b32.xlu0 %v101_v0, %s131_s10  ;;  %19 = vrot.lane.b32.xlu1 %v103_v1, %s132_s11  ;;  %v104_v3 = vld [vmem:[%s207_s0 + $0xc] sm:$0x1]   ;;  %s133_s16 = smov 42   ;;  %s134_s17 = smov 36   ;;  %v105_v4 = vld [vmem:[%s207_s0 + $0xb] sm:$0x1]  }
   0x3   :  { %v106_v5 = vld [vmem:[%s207_s0 + $0xa] sm:$0x1]   ;;  %v2_v6 = vld [vmem:[%s207_s0] sm:$0x1]   ;;  %s135_s24 = smov 33   ;;  %s136_s25 = smov 30  }
   0x4   :  { %4 = vst.msk [vmem:[#allocation0] sm:$0x1] %vm3_vm0, %v2_v6   ;;  %v107_v7 = vld [vmem:[%s207_s0 + $0x9] sm:$0x1]   ;;  %v108_v8 = vld [vmem:[%s207_s0 + $0x8] sm:$0x1]  }
   0x5   :  { %s137_s30 = smov 27   ;;  %s138_s2 = smov 24   ;;  %v109_v9 = vld [vmem:[%s207_s0 + $0x7] sm:$0x1]   ;;  %v110_v10 = vld [vmem:[%s207_s0 + $0x6] sm:$0x1]  }
   0x6   :  { %13 = vrot.lane.b32.xlu0 %v102_v2, %s133_s16  ;;  %25 = vrot.lane.b32.xlu1 %v104_v3, %s134_s17  ;;  %s139_s7 = smov 21   ;;  %s140_s8 = smov 18   ;;  %v111_v11 = vld [vmem:[%s207_s0 + $0x5] sm:$0x1]   ;;  %v112_v12 = vld [vmem:[%s207_s0 + $0x4] sm:$0x1]  }
   0x7   :  { %s141_s13 = smov 15   ;;  %s142_s14 = smov 12   ;;  %v113_v13 = vld [vmem:[%s207_s0 + $0x3] sm:$0x1]   ;;  %v114_v14 = vld [vmem:[%s207_s0 + $0x2] sm:$0x1]  }
   0x8   :  { %s143_s19 = smov 9   ;;  %s144_s20 = smov 6   ;;  %v115_v15 = vld [vmem:[%s207_s0 + $0x1] sm:$0x1]   ;;  %vm27_vm4 = vcmask 318752   ;;  %vm33_vm5 = vcmask 294152  }
   0x9   :  { %s145_s0 = smov 3   ;;  %vm39_vm6 = vcmask 269552   ;;  %vm45_vm7 = vcmask 244952   ;;  %vm51_vm8 = vcmask 220352   ;;  %vm57_vm9 = vcmask 195752  }
   0xa   :  { %31 = vrot.lane.b32.xlu0 %v105_v4, %s135_s24  ;;  %37 = vrot.lane.b32.xlu1 %v106_v5, %s136_s25  ;;  %vm63_vm10 = vcmask 171152   ;;  %vm69_vm11 = vcmask 146552   ;;  %vm75_vm12 = vcmask 121952   ;;  %vm81_vm13 = vcmask 97352  }
   0xb   :  { %vm87_vm14 = vcmask 72752   ;;  %vm93_vm15 = vcmask 48152  }
   0xe   :  { %43 = vrot.lane.b32.xlu0 %v107_v7, %s137_s30  ;;  %49 = vrot.lane.b32.xlu1 %v108_v8, %s138_s2 }
  0x12   :  { %55 = vrot.lane.b32.xlu0 %v109_v9, %s139_s7  ;;  %61 = vrot.lane.b32.xlu1 %v110_v10, %s140_s8 }
  0x16   :  { %67 = vrot.lane.b32.xlu0 %v111_v11, %s141_s13  ;;  %73 = vrot.lane.b32.xlu1 %v112_v12, %s142_s14 }
  0x1a   :  { %79 = vrot.lane.b32.xlu0 %v113_v13, %s143_s19  ;;  %85 = vrot.lane.b32.xlu1 %v114_v14, %s144_s20 }
  0x1e   :  { %91 = vrot.lane.b32.xlu0 %v115_v15, %s145_s0 }
  0x74   :  { %v8_v16 = vpop.permute.xlu0 %7   ;;  %v20_v17 = vpop.permute.xlu1 %19  }
  0x75   :  { %10 = vst.msk [vmem:[#allocation0] sm:$0x1] %vm9_vm1, %v8_v16  }
  0x78   :  { %v14_v18 = vpop.permute.xlu0 %13   ;;  %v26_v19 = vpop.permute.xlu1 %25  }
  0x79   :  { %16 = vst.msk [vmem:[#allocation0] sm:$0x1] %vm15_vm2, %v14_v18  }
  0x7a   :  { %22 = vst.msk [vmem:[#allocation0] sm:$0x1] %vm21_vm3, %v20_v17  }
  0x7b   :  { %28 = vst.msk [vmem:[#allocation0] sm:$0x1] %vm27_vm4, %v26_v19  }
  0x7c   :  { %v32_v20 = vpop.permute.xlu0 %31   ;;  %v38_v21 = vpop.permute.xlu1 %37  }
  0x7d   :  { %34 = vst.msk [vmem:[#allocation0] sm:$0x1] %vm33_vm5, %v32_v20  }
  0x7e   :  { %40 = vst.msk [vmem:[#allocation0] sm:$0x1] %vm39_vm6, %v38_v21  }
  0x80   :  { %v44_v22 = vpop.permute.xlu0 %43   ;;  %v50_v23 = vpop.permute.xlu1 %49  }
  0x81   :  { %46 = vst.msk [vmem:[#allocation0] sm:$0x1] %vm45_vm7, %v44_v22  }
  0x82   :  { %52 = vst.msk [vmem:[#allocation0] sm:$0x1] %vm51_vm8, %v50_v23  }
  0x84   :  { %v56_v24 = vpop.permute.xlu0 %55   ;;  %v62_v25 = vpop.permute.xlu1 %61  }
  0x85   :  { %58 = vst.msk [vmem:[#allocation0] sm:$0x1] %vm57_vm9, %v56_v24  }
  0x86   :  { %64 = vst.msk [vmem:[#allocation0] sm:$0x1] %vm63_vm10, %v62_v25  }
  0x88   :  { %v68_v26 = vpop.permute.xlu0 %67   ;;  %v74_v27 = vpop.permute.xlu1 %73  }
  0x89   :  { %70 = vst.msk [vmem:[#allocation0] sm:$0x1] %vm69_vm11, %v68_v26  }
  0x8a   :  { %76 = vst.msk [vmem:[#allocation0] sm:$0x1] %vm75_vm12, %v74_v27  }
  0x8c   :  { %v80_v28 = vpop.permute.xlu0 %79   ;;  %v86_v29 = vpop.permute.xlu1 %85  }
  0x8d   :  { %82 = vst.msk [vmem:[#allocation0] sm:$0x1] %vm81_vm13, %v80_v28  }
  0x8e   :  { %88 = vst.msk [vmem:[#allocation0] sm:$0x1] %vm87_vm14, %v86_v29  }
  0x90   :  { %v92_v30 = vpop.permute.xlu0 %91  }
  0x91   :  { %94 = vst.msk [vmem:[#allocation0] sm:$0x1] %vm93_vm15, %v92_v30  }
  0x98   :  { %v98_v31 = vld [vmem:[#allocation0] sm:$0x1] }
  0x99   :  { %100 = vst [vmem:[%s208_s1] sm:$0x1] %v98_v31 }

// kernel: forward.1
= control target key start
LH: loop header
LB: loop body
LE: loop exit
PB: predicated region body
PF: predicated region fallthrough
CT: control target
= control target key end

     0   :  { %v3176_v0 = vmov 0.0   ;;  %vm3177_vm0 = vmmov 0   ;;  %vm331_vm1 = vcmask 523264   ;;  %vm236_vm2 = vcmask 261120   ;;  %s3179_s8 = smov 16   ;;  %s3180_s9 = smov 32   ;;  %s4088_s1 = inlined_call_operand.vmem [shape: bf16[1024,128], index: 1, kind: input, shape index: {}]   ;;  %s4089_s0 = inlined_call_operand.vmem [shape: f32[16,320], index: 0, kind: input, shape index: {}]   ;;  %s4090_s3 = inlined_call_operand.vmem [shape: f32[160,128], index: 3, kind: input, shape index: {}]   ;;  %s4091_s2 = inlined_call_operand.vmem [shape: bf16[2,32,768], index: 2, kind: input, shape index: {}]   ;;  %s4092_s4 = inlined_call_operand.vmem [shape: f32[16,128], index: 4, kind: output, shape index: {}]  }
   0x1   :  { %2810 = vmatprep.subr.bf16.mxu1 %v3176_v0  ;;  %v3020_v1 = vld [vmem:[%s4088_s1 + $0x40] sm:$0xff]   ;;  %2818 = vmatprep.mubr.msk.bf16.mxu1 %vm3177_vm0, %v3176_v0  ;;  %v3021_v2 = vld [vmem:[%s4088_s1 + $0x90] sm:$0xff]   ;;  %v3023_v4 = vld [vmem:[%s4088_s1 + $0x48] sm:$0xff]   ;;  %s3181_s10 = smov 48   ;;  %vm911_vm3 = vcmask 130048   ;;  %vm920_vm4 = vcmask 392192  }
   0x2   :  { %2695 = vmatprep.subr.bf16.mxu0 %v3020_v1  ;;  %v3022_v3 = vld [vmem:[%s4088_s1] sm:$0xff]   ;;  %2811 = vmatpush3.bf16.msra.mxu1 %v3021_v2  ;;  %v3024_v5 = vld [vmem:[%s4088_s1 + $0x98] sm:$0xff]   ;;  %v3025_v6 = vld [vmem:[%s4088_s1 + $0x8] sm:$0xff]  }
   0x3   :  { %2696 = vmatpush3.bf16.msra.mxu0 %v3022_v3  ;;  %2812 = vmatprep.subr.bf16.mxu1 %v3176_v0  ;;  %v3026_v7 = vld [vmem:[%s4088_s1 + $0x50] sm:$0xff]   ;;  %v3027_v8 = vld [vmem:[%s4088_s1 + $0xa0] sm:$0xff]   ;;  %v3029_v10 = vld [vmem:[%s4088_s1 + $0x58] sm:$0xff]  }
   0x4   :  { %2697 = vmatprep.subr.bf16.mxu0 %v3023_v4  ;;  %v3028_v9 = vld [vmem:[%s4088_s1 + $0x10] sm:$0xff]   ;;  %v3030_v11 = vld [vmem:[%s4088_s1 + $0xa8] sm:$0xff]   ;;  %v3031_v12 = vld [vmem:[%s4088_s1 + $0x18] sm:$0xff]  }
   0x5   :  { %v22_v13 = vld [vmem:[%s4089_s0 + $0x10] sm:$0xff]  ;;  %v23_v14 = vld [vmem:[%s4089_s0 + $0x28] sm:$0xff]  ;;  %v3032_v15 = vld [vmem:[%s4088_s1 + $0x60] sm:$0xff]  }
   0x6   :  { %2813 = vmatpush3.bf16.msra.mxu1 %v3024_v5  ;;  %v304_v16 = vpack.c.bf16 %v23_v14, %v22_v13  ;;  %v3033_v17 = vld [vmem:[%s4088_s1 + $0x20] sm:$0xff]   ;;  %v3034_v18 = vld [vmem:[%s4088_s1 + $0x68] sm:$0xff]   ;;  %v3036_v21 = vld [vmem:[%s4088_s1 + $0x70] sm:$0xff]  }
   0x7   :  { %2698 = vmatpush3.bf16.msra.mxu0 %v3025_v6  ;;  %2814 = vmatprep.subr.bf16.mxu1 %v3176_v0  ;;  %v3035_v19 = vld [vmem:[%s4088_s1 + $0x28] sm:$0xff]   ;;  %v21_v22 = vld [vmem:[%s4089_s0 + $0x20] sm:$0xff]  ;;  %v3037_v23 = vld [vmem:[%s4088_s1 + $0x30] sm:$0xff]  }
   0x8   :  { %2699 = vmatprep.subr.bf16.mxu0 %v3026_v7  ;;  %v19_v20 = vld [vmem:[%s4089_s0 + $0x8] sm:$0xff]  ;;  %v3038_v25 = vld [vmem:[%s4088_s1 + $0x78] sm:$0xff]   ;;  %v18_v27 = vld [vmem:[%s4089_s0] sm:$0xff] }
   0x9   :  { %v57_v24 = vpack.c.bf16 %v21_v22, %v19_v20  ;;  %v3039_v26 = vld [vmem:[%s4088_s1 + $0x38] sm:$0xff]   ;;  %v3040_v30 = vld [vmem:[%s4088_s1 + $0x80] sm:$0xff]   ;;  %v3041_v31 = vld [vmem:[%s4088_s1 + $0x88] sm:$0xff]  }
   0xa   :  { %2815 = vmatpush3.bf16.msra.mxu1 %v3027_v8  ;;  %v20_v28 = vld [vmem:[%s4089_s0 + $0x18] sm:$0xff]  ;;  %v305_v32 = vld [vmem:[%s4090_s3] sm:$0xff]  ;;  %v306_v34 = vld [vmem:[%s4090_s3 + $0x8] sm:$0xff] }
   0xb   :  { %2700 = vmatpush3.bf16.msra.mxu0 %v3028_v9  ;;  %2816 = vmatprep.subr.bf16.mxu1 %v3176_v0  ;;  %v56_v29 = vpack.c.bf16 %v20_v28, %v18_v27  ;;  %v2539_v43 = vld [vmem:[%s4090_s3 + $0x80] ss:$0 sm:$0xff]  ;;  %v3044_v9 = vld [vmem:[%s4091_s2 + $0x4] ss:$24 sps:$4 sm:$0xff]   ;;  %v3050_v13 = vld [vmem:[%s4091_s2 + $0x34] ss:$24 sps:$4 sm:$0xff]  }
   0xc   :  { %2701 = vmatprep.subr.bf16.mxu0 %v3029_v10  ;;  %191 = vmatprep.mubr.bf16.mxu0 %v57_v24  ;;  %v3042_v10 = vld [vmem:[%s4091_s2] ss:$24 sps:$4 sm:$0xff]   ;;  %v3053_v14 = vld [vmem:[%s4091_s2 + $0x3c] ss:$24 sps:$4 sm:$0xff]  }
   0xe   :  { %2817 = vmatpush3.bf16.msra.mxu1 %v3030_v11  ;;  %v3045_v11 = vld [vmem:[%s4091_s2 + $0x8] ss:$24 sps:$4 sm:$0xff]  }
   0xf   :  { %2702 = vmatpush3.bf16.msra.mxu0 %v3031_v12  ;;  %473 = vmatprep.subr.bf16.mxu1 %v3044_v9  ;;  %v3047_v12 = vld [vmem:[%s4091_s2 + $0xc] ss:$24 sps:$4 sm:$0xff]  }
  0x10   :  { %2703 = vmatprep.subr.bf16.mxu0 %v3032_v15  ;;  %v3048_v15 = vld [vmem:[%s4091_s2 + $0x30] ss:$24 sps:$4 sm:$0xff]  }
  0x11   :  { %2819 = vmatmul.mubr.msk.bf16.vlgmr.msra.gmra.mrb[0].mxu1 %vm331_vm1, %v304_v16  ;;  %v3051_v16 = vld [vmem:[%s4091_s2 + $0x38] ss:$24 sps:$4 sm:$0xff]  }
  0x12   :  { %474 = vmatpush1.bf16.msra.mxu1 %v3042_v10 }
  0x13   :  { %2704 = vmatpush3.bf16.msra.mxu0 %v3033_v17  ;;  %475 = vmatprep.subr.bf16.mxu1 %v3050_v13  ;;  %v3056_v17 = vld [vmem:[%s4091_s2 + $0x14] ss:$24 sps:$4 sm:$0xff]  }
  0x14   :  { %2705 = vmatprep.subr.bf16.mxu0 %v3034_v18  ;;  %v3178_v18 = vmov 0  }
  0x15   :  { %505 = vmatprep.mubr.bf16.mxu1 %v3178_v18 }
  0x16   :  { %476 = vmatpush1.bf16.msra.mxu1 %v3048_v15 }
  0x17   :  { %2706 = vmatpush3.bf16.msra.mxu0 %v3035_v19  ;;  %559 = vmatprep.subr.bf16.mxu1 %v3056_v17  ;;  %v2558_v19 = vld [vmem:[%s4090_s3 + $0x81] ss:$0 sm:$0xff] }
  0x18   :  { %2707 = vmatprep.subr.bf16.mxu0 %v3036_v21 }
  0x1b   :  { %2708 = vmatpush3.bf16.msra.mxu0 %v3037_v23 }
  0x1c   :  { %2709 = vmatprep.subr.bf16.mxu0 %v3038_v25 }
  0x1f   :  { %2710 = vmatpush3.bf16.msra.mxu0 %v3039_v26 }
  0x20   :  { %2802 = vmatprep.subr.bf16.mxu0 %v3176_v0 }
  0x22   :  { %192 = vmatmul.mubr.bf16.vlgmr.msra.gmra.mrb[0].mxu0 %v56_v29 }
  0x23   :  { %2806 = vmatprep.mubr.msk.bf16.mxu0 %vm3177_vm0, %v3176_v0  ;;  %2803 = vmatpush3.bf16.msra.mxu0 %v3040_v30 }
  0x24   :  { %2804 = vmatprep.subr.bf16.mxu0 %v3176_v0 }
  0x27   :  { %2805 = vmatpush3.bf16.msra.mxu0 %v3041_v31 }
  0x28   :  { %516 = vmatprep.subr.bf16.mxu0 %v3047_v12 }
  0xe4   :  { %v369_v33 = vpop.f32.mrb[0].mxu1 }
  0xe5   :  { %v3308_v35 = vadd.f32 %v369_v33, %v305_v32  ;;  %v2820_v36 = vpop.f32.mrb[1].mxu1 }
  0xe6   :  { %v372_v37 = vpop.f32.mrb[2].mxu1 }
  0xe7   :  { %v602_v38 = vsel %vm236_vm2, %v3308_v35, 0.0  ;;  %v3312_v39 = vadd.f32 %v372_v37, %v306_v34  ;;  %v2821_v40 = vpop.f32.mrb[3].mxu1  ;;  %v3054_v37 = vld [vmem:[%s4091_s2 + $0x10] ss:$24 sps:$4 sm:$0xff]  }
  0xe8   :  { %603 = vadd.xlane.f32.xlu0 %v602_v38  ;;  %v3059_v40 = vld [vmem:[%s4091_s2 + $0x44] ss:$24 sps:$4 sm:$0xff]  }
  0xe9   :  { %v605_v41 = vsel %vm236_vm2, %v3312_v39, 0.0 }
  0xec   :  { %606 = vadd.xlane.f32.xlu0 %v605_v41  ;;  %v3057_v41 = vld [vmem:[%s4091_s2 + $0x40] ss:$24 sps:$4 sm:$0xff]  }
  0xf5   :  { %v2711_v42 = vpop.f32.mrb[0].mxu0 }
  0xf6   :  { %v2712_v44 = vpop.f32.mrb[1].mxu0 }
  0xf7   :  { %v2713_v45 = vadd.f32 %v2712_v44, %v2711_v42  ;;  %v2714_v46 = vpop.f32.mrb[2].mxu0  ;;  %v3060_v42 = vld [vmem:[%s4088_s1 + $0xe0] sm:$0xff]   ;;  %v3062_v44 = vld [vmem:[%s4088_s1 + $0xe8] sm:$0xff]  }
  0xf8   :  { %v2715_v47 = vpop.f32.mrb[3].mxu0 }
  0xf9   :  { %v194_v48 = vadd.f32 %v2713_v45, %v2539_v43  ;;  %v2716_v49 = vadd.f32 %v2715_v47, %v2714_v46  ;;  %v3063_v45 = vld [vmem:[%s4088_s1 + $0xf8] sm:$0xff]  }
  0xfb   :  { %v2556_v50 = vmul.f32 -1.442695, %v194_v48  ;;  %v197_v51 = vadd.f32 %v2716_v49, %v2539_v43  ;;  %v3061_v43 = vld [vmem:[%s4088_s1 + $0xf0] sm:$0xff]  }
  0xfd   :  { %3120 = vpow2.f32 %v2556_v50  ;;  %v2557_v52 = vmul.f32 -1.442695, %v197_v51 }
  0xff   :  { %3122 = vpow2.f32 %v2557_v52  ;;  %v2584_v52 = vld [vmem:[%s4090_s3 + $0x84] ss:$0 sm:$0xff] }
 0x107   :  { %v3121_v53 = vpop.eup %3120 }
 0x108   :  { %v206_v54 = vadd.f32 1.0, %v3121_v53 }
 0x109   :  { %v3123_v55 = vpop.eup %3122 }
 0x10a   :  { %3124 = vrcp.f32 %v206_v54  ;;  %v207_v56 = vadd.f32 1.0, %v3123_v55 }
 0x10c   :  { %3126 = vrcp.f32 %v207_v56 }
 0x114   :  { %v3125_v57 = vpop.eup %3124 }
 0x115   :  { %v212_v59 = vmul.f32 %v3125_v57, %v194_v48 }
 0x116   :  { %v3127_v58 = vpop.eup %3126 }
 0x117   :  { %v213_v60 = vmul.f32 %v3127_v58, %v197_v51 }
 0x119   :  { %v218_v61 = vpack.c.bf16 %v213_v60, %v212_v59 }
 0x11b   :  { %2807 = vmatmul.mubr.msk.bf16.vlgmr.msra.gmra.mrb[4].mxu0 %vm236_vm2, %v218_v61 }
 0x11c   :  { %517 = vmatpush1.bf16.msra.mxu0 %v3045_v11  ;;  %548 = vmatprep.mubr.bf16.mxu0 %v3178_v18 }
 0x11d   :  { %518 = vmatprep.subr.bf16.mxu0 %v3053_v14 }
 0x120   :  { %519 = vmatpush1.bf16.msra.mxu0 %v3051_v16 }
 0x121   :  { %2822 = vmatprep.subr.bf16.mxu0 %v3176_v0 }
 0x175   :  { %v604_v62 = vpop.xlane.xlu0 %603 }
 0x176   :  { %v609_v63 = vmul.f32 0.03125, %v604_v62  ;;  %v2585_v62 = vld [vmem:[%s4090_s3 + $0x83] ss:$0 sm:$0xff] }
 0x178   :  { %v3321_v1 = vsub.f32 %v3308_v35, %v609_v63 }
 0x179   :  { %v607_v2 = vpop.xlane.xlu0 %606 }
 0x17a   :  { %v610_v3 = vmul.f32 0.03125, %v607_v2  ;;  %v613_v4 = vmul.f32 %v3321_v1, %v3321_v1 }
 0x17c   :  { %v3326_v5 = vsub.f32 %v3312_v39, %v610_v3  ;;  %v615_v6 = vsel %vm236_vm2, %v613_v4, 0.0 }
 0x17d   :  { %616 = vadd.xlane.f32.xlu1 %v615_v6 }
 0x17e   :  { %v614_v7 = vmul.f32 %v3326_v5, %v3326_v5 }
 0x180   :  { %v618_v8 = vsel %vm236_vm2, %v614_v7, 0.0 }
 0x181   :  { %619 = vadd.xlane.f32.xlu1 %v618_v8 }
 0x1ee   :  { %v274_v20 = vpop.f32.mrb[4].mxu0 }
 0x1ef   :  { %v275_v21 = vadd.f32 %v2558_v19, %v274_v20  ;;  %v2808_v22 = vpop.f32.mrb[5].mxu0 }
 0x1f0   :  { %v277_v23 = vpop.f32.mrb[6].mxu0  ;;  %v2586_v22 = vld [vmem:[%s4090_s3 + $0x90] ss:$0 sm:$0xff] }
 0x1f1   :  { %v2562_v24 = vmul.f32 -1.442695, %v275_v21  ;;  %v278_v25 = vadd.f32 %v2558_v19, %v277_v23  ;;  %v2809_v26 = vpop.f32.mrb[7].mxu0 }
 0x1f3   :  { %3128 = vpow2.f32 %v2562_v24  ;;  %v2563_v27 = vmul.f32 -1.442695, %v278_v25 }
 0x1f5   :  { %3130 = vpow2.f32 %v2563_v27 }
 0x1fd   :  { %v3129_v28 = vpop.eup %3128 }
 0x1fe   :  { %v287_v29 = vadd.f32 1.0, %v3129_v28 }
 0x1ff   :  { %v3131_v30 = vpop.eup %3130 }
 0x200   :  { %3132 = vrcp.f32 %v287_v29  ;;  %v288_v31 = vadd.f32 1.0, %v3131_v30 }
 0x202   :  { %3134 = vrcp.f32 %v288_v31 }
 0x20a   :  { %v3133_v32 = vpop.eup %3132  ;;  %v617_v46 = vpop.xlane.xlu1 %616 }
 0x20b   :  { %v293_v34 = vmul.f32 %v3133_v32, %v275_v21  ;;  %v621_v48 = vmul.f32 0.03125, %v617_v46  ;;  %v2590_v21 = vld [vmem:[%s4090_s3 + $0x91] ss:$0 sm:$0xff] }
 0x20c   :  { %v3135_v33 = vpop.eup %3134  ;;  %v3478_v46 = vld [vmem:[%s4090_s3 + $0x50] sm:$0xff] }
 0x20d   :  { %v294_v36 = vmul.f32 %v3135_v33, %v278_v25  ;;  %v623_v50 = vadd.f32 1e-06, %v621_v48 }
 0x20e   :  { %v620_v47 = vpop.xlane.xlu1 %619 }
 0x20f   :  { %v3368_v38 = vpack.c.bf16 %v294_v36, %v293_v34  ;;  %v622_v49 = vmul.f32 0.03125, %v620_v47  ;;  %3136 = vrsqrt.f32 %v623_v50  ;;  %v3483_v47 = vld [vmem:[%s4090_s3 + $0x28] sm:$0xff] }
 0x210   :  { %v3493_v50 = vld [vmem:[%s4090_s3 + $0x48] sm:$0xff] }
 0x211   :  { %2581 = vmatmul.mubr.msk.bf16.vlgmr.msra.gmra.mrb[4].mxu1 %vm236_vm2, %v3368_v38  ;;  %2582 = vmatmul.mubr.msk.bf16.vlgmr.msra.gmra.mrb[8].mxu0 %vm236_vm2, %v3368_v38  ;;  %v624_v51 = vadd.f32 1e-06, %v622_v49  ;;  %v3488_v49 = vld [vmem:[%s4090_s3 + $0x38] sm:$0xff] }
 0x212   :  { %560 = vmatpush1.bf16.msra.mxu1 %v3054_v37  ;;  %591 = vmatprep.mubr.bf16.mxu1 %v3178_v18  ;;  %v2594_v37 = vld [vmem:[%s4090_s3 + $0x92] ss:$0 sm:$0xff] }
 0x213   :  { %561 = vmatprep.subr.bf16.mxu1 %v3059_v40  ;;  %2826 = vmatprep.mubr.msk.bf16.mxu0 %vm3177_vm0, %v3176_v0  ;;  %3138 = vrsqrt.f32 %v624_v51  ;;  %v3498_v51 = vld [vmem:[%s4090_s3 + $0x58] sm:$0xff] }
 0x214   :  { %2823 = vmatpush3.bf16.msra.mxu0 %v3060_v42  ;;  %v3468_v42 = vld [vmem:[%s4090_s3 + $0x30] sm:$0xff] }
 0x215   :  { %2824 = vmatprep.subr.bf16.mxu0 %v3176_v0 }
 0x216   :  { %562 = vmatpush1.bf16.msra.mxu1 %v3057_v41  ;;  %v3463_v41 = vld [vmem:[%s4090_s3 + $0x20] sm:$0xff] }
 0x217   :  { %2830 = vmatprep.subr.bf16.mxu1 %v3176_v0 }
 0x218   :  { %2825 = vmatpush3.bf16.msra.mxu0 %v3062_v44 }
 0x219   :  { %2583 = vmatmul.mubr.msk.bf16.vlgmr.msra.gmra.mrb[8].mxu1 %vm236_vm2, %v3368_v38  ;;  %2838 = vmatprep.subr.bf16.mxu0 %v3176_v0  ;;  %v3137_v55 = vpop.eup %3136 }
 0x21a   :  { %2834 = vmatprep.mubr.msk.bf16.mxu1 %vm3177_vm0, %v3176_v0  ;;  %2831 = vmatpush3.bf16.msra.mxu1 %v3061_v43  ;;  %v627_v3 = vmul.f32 %v3137_v55, %v3321_v1  ;;  %v3064_v1 = vld [vmem:[%s4088_s1 + $0x100] sm:$0xff]  }
 0x21b   :  { %2832 = vmatprep.subr.bf16.mxu1 %v3176_v0 }
 0x21d   :  { %v3139_v61 = vpop.eup %3138 }
 0x21e   :  { %2833 = vmatpush3.bf16.msra.mxu1 %v3063_v45  ;;  %v628_v9 = vmul.f32 %v3139_v61, %v3326_v5  ;;  %v3065_v5 = vld [vmem:[%s4088_s1 + $0x108] sm:$0xff]   ;;  %v3473_v45 = vld [vmem:[%s4090_s3 + $0x40] sm:$0xff] }
 0x21f   :  { %2846 = vmatprep.subr.bf16.mxu1 %v3176_v0 }
 0x2e4   :  { %v507_v53 = vpop.f32.mrb[4].mxu1  ;;  %v3407_v54 = vpop.f32.mrb[8].mxu0 }
 0x2e5   :  { %v509_v56 = vpop.f32.mrb[5].mxu1  ;;  %v3409_v57 = vpop.f32.mrb[9].mxu0  ;;  %v645_v7 = vadd.f32 %v2585_v62, %v507_v53 }
 0x2e6   :  { %v634_v58 = vadd.f32 %v2584_v52, %v509_v56  ;;  %v511_v59 = vpop.f32.mrb[6].mxu1  ;;  %v3411_v60 = vpop.f32.mrb[10].mxu0 }
 0x2e7   :  { %v513_v63 = vpop.f32.mrb[7].mxu1  ;;  %v3416_v2 = vpop.f32.mrb[11].mxu0  ;;  %v646_v12 = vadd.f32 %v2585_v62, %v511_v59 }
 0x2e8   :  { %v636_v4 = vadd.f32 1.0, %v634_v58  ;;  %v635_v6 = vadd.f32 %v2584_v52, %v513_v63 }
 0x2ea   :  { %v638_v8 = vmul.f32 %v636_v4, %v627_v3  ;;  %v637_v10 = vadd.f32 1.0, %v635_v6 }
 0x2ec   :  { %v647_v11 = vadd.f32 %v645_v7, %v638_v8  ;;  %v639_v13 = vmul.f32 %v637_v10, %v628_v9  ;;  %v3420_v14 = vpop.f32.mrb[8].mxu1 }
 0x2ed   :  { %v3422_v15 = vpop.f32.mrb[9].mxu1 }
 0x2ee   :  { %v648_v16 = vadd.f32 %v646_v12, %v639_v13  ;;  %v3424_v17 = vpop.f32.mrb[10].mxu1 }
 0x2ef   :  { %v3426_v19 = vpop.f32.mrb[11].mxu1 }
 0x2f0   :  { %v649_v20 = vpack.c.bf16 %v648_v16, %v647_v11 }
 0x2f2   :  { %2827 = vmatmul.mubr.msk.bf16.vlgmr.msra.gmra.mrb[12].mxu0 %vm236_vm2, %v649_v20  ;;  %2835 = vmatmul.mubr.msk.bf16.vlgmr.msra.gmra.mrb[12].mxu1 %vm236_vm2, %v649_v20 }
 0x2f3   :  { %2839 = vmatpush3.bf16.msra.mxu0 %v3064_v1  ;;  %2842 = vmatprep.mubr.msk.bf16.mxu0 %vm3177_vm0, %v3176_v0 }
 0x2f4   :  { %2840 = vmatprep.subr.bf16.mxu0 %v3176_v0  ;;  %2850 = vmatprep.mubr.msk.bf16.mxu1 %vm3177_vm0, %v3176_v0 }
 0x2f7   :  { %2841 = vmatpush3.bf16.msra.mxu0 %v3065_v5 }
 0x2f8   :  { %2854 = vmatprep.subr.bf16.mxu0 %v3176_v0 }
 0x2fa   :  { %2843 = vmatmul.mubr.msk.bf16.vlgmr.msra.gmra.mrb[16].mxu0 %vm236_vm2, %v649_v20 }
 0x2fb   :  { %2862 = vmatprep.mubr.msk.bf16.mxu0 %vm3177_vm0, %v3176_v0 }
 0x3c5   :  { %v708_v23 = vpop.f32.mrb[12].mxu0  ;;  %v770_v24 = vpop.f32.mrb[12].mxu1 }
 0x3c6   :  { %v771_v25 = vadd.f32 %v2590_v21, %v770_v24  ;;  %v2828_v26 = vpop.f32.mrb[13].mxu0  ;;  %v2836_v27 = vpop.f32.mrb[13].mxu1  ;;  %v3451_v30 = vadd.f32 %v2586_v22, %v708_v23  ;;  %v3549_v23 = vld [vmem:[%s4090_s3 + $0x60] sm:$0xff] }
 0x3c7   :  { %v711_v28 = vpop.f32.mrb[14].mxu0  ;;  %v773_v29 = vpop.f32.mrb[14].mxu1  ;;  %v3556_v26 = vld [vmem:[%s4090_s3 + $0x68] sm:$0xff] }
 0x3c8   :  { %v3453_v31 = vadd.f32 %v2586_v22, %v711_v28  ;;  %839 = vxpose.xlu0.b32.start [1/2] (short) (narrow) %v771_v25, 32  ;;  %v2829_v32 = vpop.f32.mrb[15].mxu0  ;;  %v2837_v33 = vpop.f32.mrb[15].mxu1  ;;  %v774_v36 = vadd.f32 %v2590_v21, %v773_v29 }
 0x3ca   :  { %v943_v34 = vpack.c.bf16 %v3453_v31, %v3451_v30  ;;  %v3607_v30 = vld [vmem:[%s4090_s3 + $0x10] sm:$0xff] }
 0x3cc   :  { %840 = vxpose.xlu0.b32.end [2/2] (short) (narrow) %v774_v36, 32 }
 0x3cd   :  { %v832_v40 = vpop.f32.mrb[16].mxu0 }
 0x3ce   :  { %v833_v43 = vadd.f32 %v2594_v37, %v832_v40  ;;  %v2844_v44 = vpop.f32.mrb[17].mxu0 }
 0x3cf   :  { %v835_v48 = vpop.f32.mrb[18].mxu0 }
 0x3d0   :  { %v2845_v52 = vpop.f32.mrb[19].mxu0  ;;  %v836_v53 = vadd.f32 %v2594_v37, %v835_v48  ;;  %v3501_v55 = vmul.f32 %v833_v43, %v3463_v41  ;;  %v3504_v56 = vmul.f32 %v833_v43, %v3468_v42  ;;  %v3507_v58 = vmul.f32 %v833_v43, %v3473_v45 }
 0x3d1   :  { %v3510_v59 = vmul.f32 %v833_v43, %v3478_v46 }
 0x3d2   :  { %v3513_v61 = vmul.f32 %v836_v53, %v3483_v47  ;;  %v3516_v62 = vmul.f32 %v836_v53, %v3488_v49  ;;  %v3519_v63 = vmul.f32 %v836_v53, %v3493_v50  ;;  %v3522_v3 = vmul.f32 %v836_v53, %v3498_v51 }
 0x3d4   :  { %v939_v4 = vpack.c.bf16 %v3513_v61, %v3501_v55  ;;  %v940_v6 = vpack.c.bf16 %v3516_v62, %v3504_v56  ;;  %v941_v7 = vpack.c.bf16 %v3519_v63, %v3507_v58  ;;  %v942_v8 = vpack.c.bf16 %v3522_v3, %v3510_v59  ;;  %v3621_v3 = vld [vmem:[%s4088_s1 + $0xb0] sm:$0xff]  }
 0x3d5   :  { %2855 = vmatpush3.bf16.msra.mxu0 %v3621_v3 }
 0x3d6   :  { %2856 = vmatprep.subr.bf16.mxu0 %v3176_v0 }
 0x448   :  { %v855_v9 = vpop.trf.xlu0 }
 0x449   :  { %875 = vrot.lane.b32.xlu1 %v855_v9, %s3179_s8 }
 0x44c   :  { %v856_v10 = vpop.trf.xlu0 }
 0x44d   :  { %887 = vrot.lane.b32.xlu1 %v855_v9, %s3180_s9 }
 0x450   :  { %v857_v11 = vpop.trf.xlu0 }
 0x451   :  { %899 = vrot.lane.b32.xlu1 %v855_v9, %s3181_s10 }
 0x454   :  { %v858_v12 = vpop.trf.xlu0 }
 0x455   :  { %877 = vrot.lane.b32.xlu1 %v856_v10, %s3179_s8  ;;  %893 = vrot.lane.b32.xlu0 %v858_v12, %s3180_s9 }
 0x459   :  { %889 = vrot.lane.b32.xlu1 %v856_v10, %s3180_s9 }
 0x45d   :  { %901 = vrot.lane.b32.xlu1 %v856_v10, %s3181_s10 }
 0x461   :  { %879 = vrot.lane.b32.xlu1 %v857_v11, %s3179_s8 }
 0x465   :  { %891 = vrot.lane.b32.xlu1 %v857_v11, %s3180_s9 }
 0x469   :  { %881 = vrot.lane.b32.xlu1 %v858_v12, %s3179_s8 }
 0x46d   :  { %903 = vrot.lane.b32.xlu1 %v857_v11, %s3181_s10 }
 0x471   :  { %905 = vrot.lane.b32.xlu1 %v858_v12, %s3181_s10 }
 0x4bb   :  { %v876_v13 = vpop.permute.xlu1 %875 }
 0x4bc   :  { %v912_v21 = vsel %vm911_vm3, %v855_v9, %v876_v13 }
 0x4bf   :  { %v888_v16 = vpop.permute.xlu1 %887 }
 0x4c0   :  { %v916_v22 = vsel %vm236_vm2, %v912_v21, %v888_v16  ;;  %v3575_v16 = vld [vmem:[%s4090_s3 + $0x78] sm:$0xff] }
 0x4c3   :  { %v900_v1 = vpop.permute.xlu1 %899 }
 0x4c4   :  { %v921_v24 = vsel %vm920_vm4, %v916_v22, %v900_v1 }
 0x4c5   :  { %v925_v32 = vmul.f32 %v921_v24, %v3549_v23 }
 0x4c7   :  { %v878_v20 = vpop.permute.xlu1 %877  ;;  %v894_v52 = vpop.permute.xlu0 %893 }
 0x4c8   :  { %v913_v25 = vsel %vm911_vm3, %v856_v10, %v878_v20  ;;  %v3569_v10 = vld [vmem:[%s4090_s3 + $0x70] sm:$0xff] }
 0x4cb   :  { %v890_v5 = vpop.permute.xlu1 %889 }
 0x4cc   :  { %v917_v27 = vsel %vm236_vm2, %v913_v25, %v890_v5 }
 0x4cf   :  { %v902_v28 = vpop.permute.xlu1 %901 }
 0x4d0   :  { %v922_v29 = vsel %vm920_vm4, %v917_v27, %v902_v28 }
 0x4d1   :  { %v926_v33 = vmul.f32 %v922_v29, %v3556_v26 }
 0x4d3   :  { %v929_v36 = vpack.c.bf16 %v926_v33, %v925_v32  ;;  %v880_v37 = vpop.permute.xlu1 %879 }
 0x4d4   :  { %v914_v48 = vsel %vm911_vm3, %v857_v11, %v880_v37 }
 0x4d5   :  { %2847 = vmatpush3.bf16.msra.mxu1 %v929_v36  ;;  %v3070_v36 = vld [vmem:[%s4088_s1 + $0x110] sm:$0xff]  }
 0x4d6   :  { %2848 = vmatprep.subr.bf16.mxu1 %v3176_v0 }
 0x4d7   :  { %v892_v40 = vpop.permute.xlu1 %891 }
 0x4d8   :  { %v918_v9 = vsel %vm236_vm2, %v914_v48, %v892_v40 }
 0x4db   :  { %v882_v43 = vpop.permute.xlu1 %881 }
 0x4dc   :  { %v915_v53 = vsel %vm911_vm3, %v858_v12, %v882_v43 }
 0x4dd   :  { %v919_v1 = vsel %vm236_vm2, %v915_v53, %v894_v52 }
 0x4df   :  { %v904_v44 = vpop.permute.xlu1 %903 }
 0x4e0   :  { %v923_v13 = vsel %vm920_vm4, %v918_v9, %v904_v44 }
 0x4e1   :  { %v927_v12 = vmul.f32 %v923_v13, %v3569_v10 }
 0x4e3   :  { %v906_v11 = vpop.permute.xlu1 %905 }
 0x4e4   :  { %v924_v20 = vsel %vm920_vm4, %v919_v1, %v906_v11  ;;  %v3071_v1 = vld [vmem:[%s4088_s1 + $0x118] sm:$0xff]  }
 0x4e5   :  { %v928_v5 = vmul.f32 %v924_v20, %v3575_v16 }
 0x4e7   :  { %v930_v21 = vpack.c.bf16 %v928_v5, %v927_v12 }
 0x4e9   :  { %2849 = vmatpush3.bf16.msra.mxu1 %v930_v21 }
 0x4ea   :  { %2866 = vmatprep.subr.bf16.mxu1 %v3176_v0 }
 0x4ec   :  { %2851 = vmatmul.mubr.msk.bf16.vlgmr.msra.gmra.mrb[16].mxu1 %vm236_vm2, %v943_v34  ;;  %v3612_v34 = vld [vmem:[%s4090_s3 + $0x18] sm:$0xff] }
 0x4ed   :  { %2867 = vmatpush3.bf16.msra.mxu1 %v939_v4  ;;  %2874 = vmatprep.mubr.msk.bf16.mxu1 %vm3177_vm0, %v3176_v0  ;;  %v3628_v4 = vld [vmem:[%s4088_s1 + $0xb8] sm:$0xff]  }
 0x4ee   :  { %2868 = vmatprep.subr.bf16.mxu1 %v3176_v0  ;;  %2857 = vmatpush3.bf16.msra.mxu0 %v3628_v4 }
 0x4ef   :  { %2858 = vmatprep.subr.bf16.mxu0 %v3176_v0 }
 0x4f1   :  { %2869 = vmatpush3.bf16.msra.mxu1 %v940_v6  ;;  %v3634_v6 = vld [vmem:[%s4088_s1 + $0xc0] sm:$0xff]  }
 0x4f2   :  { %2870 = vmatprep.subr.bf16.mxu1 %v3176_v0  ;;  %2859 = vmatpush3.bf16.msra.mxu0 %v3634_v6 }
 0x4f3   :  { %2860 = vmatprep.subr.bf16.mxu0 %v3176_v0 }
 0x4f5   :  { %2871 = vmatpush3.bf16.msra.mxu1 %v941_v7  ;;  %v3641_v7 = vld [vmem:[%s4088_s1 + $0xc8] sm:$0xff]  }
 0x4f6   :  { %2872 = vmatprep.subr.bf16.mxu1 %v3176_v0  ;;  %2861 = vmatpush3.bf16.msra.mxu0 %v3641_v7 }
 0x4f7   :  { %2878 = vmatprep.subr.bf16.mxu0 %v3176_v0 }
 0x4f9   :  { %2873 = vmatpush3.bf16.msra.mxu1 %v942_v8 }
 0x4fa   :  { %2886 = vmatprep.subr.bf16.mxu1 %v3176_v0 }
 0x5bf   :  { %v981_v31 = vpop.f32.mrb[16].mxu1 }
 0x5c0   :  { %v982_v55 = vadd.f32 %v981_v31, %v3607_v30  ;;  %v2852_v56 = vpop.f32.mrb[17].mxu1  ;;  %v2609_v31 = vld [vmem:[%s4090_s3 + $0x85] ss:$0 sm:$0xff] }
 0x5c1   :  { %v984_v58 = vpop.f32.mrb[18].mxu1 }
 0x5c2   :  { %v985_v59 = vadd.f32 %v984_v58, %v3612_v34  ;;  %v2853_v61 = vpop.f32.mrb[19].mxu1  ;;  %v988_v62 = vsel %vm331_vm1, %v982_v55, -inf  ;;  %v1189_v58 = vadd.f32 %v2609_v31, %v3407_v54 }
 0x5c3   :  { %989 = vmax.xlane.f32.xlu1 %v988_v62 }
 0x5c4   :  { %v991_v63 = vsel %vm331_vm1, %v985_v59, -inf }
 0x5c7   :  { %992 = vmax.xlane.f32.xlu1 %v991_v63  ;;  %v1190_v63 = vadd.f32 %v2609_v31, %v3411_v60 }
 0x650   :  { %v990_v8 = vpop.xlane.xlu1 %989 }
 0x651   :  { %v994_v22 = vsub.f32 %v982_v55, %v990_v8  ;;  %v2605_v55 = vld [vmem:[%s4090_s3 + $0x93] ss:$0 sm:$0xff] }
 0x653   :  { %v996_v24 = vmul.f32 1.442695, %v994_v22 }
 0x654   :  { %v993_v25 = vpop.xlane.xlu1 %992 }
 0x655   :  { %v995_v27 = vsub.f32 %v985_v59, %v993_v25  ;;  %3140 = vpow2.f32 %v996_v24 }
 0x657   :  { %v998_v28 = vmul.f32 1.442695, %v995_v27 }
 0x659   :  { %3142 = vpow2.f32 %v998_v28 }
 0x65f   :  { %v3141_v29 = vpop.eup %3140 }
 0x663   :  { %v3143_v32 = vpop.eup %3142 }
 0x664   :  { %v1000_v33 = vpack.c.bf16 %v3143_v32, %v3141_v29 }
 0x666   :  { %2863 = vmatmul.mubr.msk.bf16.vlgmr.msra.gmra.mrb[20].mxu0 %vm331_vm1, %v1000_v33 }
 0x667   :  { %2882 = vmatprep.mubr.msk.bf16.mxu0 %vm3177_vm0, %v3176_v0  ;;  %2879 = vmatpush3.bf16.msra.mxu0 %v3070_v36 }
 0x668   :  { %2880 = vmatprep.subr.bf16.mxu0 %v3176_v0 }
 0x66b   :  { %2881 = vmatpush3.bf16.msra.mxu0 %v3071_v1 }
 0x66c   :  { %2894 = vmatprep.subr.bf16.mxu0 %v3176_v0 }
 0x739   :  { %v1062_v37 = vpop.f32.mrb[20].mxu0 }
 0x73a   :  { %3144 = vrcp.f32 %v1062_v37  ;;  %v2864_v40 = vpop.f32.mrb[21].mxu0 }
 0x73b   :  { %v1065_v43 = vpop.f32.mrb[22].mxu0 }
 0x73c   :  { %3146 = vrcp.f32 %v1065_v43  ;;  %v2865_v44 = vpop.f32.mrb[23].mxu0 }
 0x744   :  { %v3145_v48 = vpop.eup %3144 }
 0x745   :  { %v1071_v53 = vmul.f32 %v3145_v48, %v3141_v29  ;;  %v3072_v48 = vld [vmem:[%s4088_s1 + $0x120] sm:$0xff]  }
 0x746   :  { %v3147_v52 = vpop.eup %3146 }
 0x747   :  { %v1072_v9 = vmul.f32 %v3147_v52, %v3143_v32  ;;  %v3073_v52 = vld [vmem:[%s4088_s1 + $0x128] sm:$0xff]  }
 0x749   :  { %v1073_v13 = vpack.c.bf16 %v1072_v9, %v1071_v53  ;;  %v3076_v53 = vld [vmem:[%s4091_s2 + $0x64] ss:$24 sps:$4 sm:$0xff]  }
 0x74b   :  { %2875 = vmatmul.mubr.msk.bf16.vlgmr.msra.gmra.mrb[20].mxu1 %vm331_vm1, %v1073_v13 }
 0x74c   :  { %2890 = vmatprep.mubr.msk.bf16.mxu1 %vm3177_vm0, %v3176_v0  ;;  %2887 = vmatpush3.bf16.msra.mxu1 %v3072_v48  ;;  %v3096_v48 = vld [vmem:[%s4088_s1 + $0x150] sm:$0xff]  }
 0x74d   :  { %2888 = vmatprep.subr.bf16.mxu1 %v3176_v0 }
 0x750   :  { %2889 = vmatpush3.bf16.msra.mxu1 %v3073_v52  ;;  %v3097_v52 = vld [vmem:[%s4088_s1 + $0x158] sm:$0xff]  }
 0x751   :  { %1520 = vmatprep.subr.bf16.mxu1 %v3076_v53  ;;  %v3098_v53 = vld [vmem:[%s4088_s1 + $0x160] sm:$0xff]  }
 0x81e   :  { %v1111_v11 = vpop.f32.mrb[20].mxu1 }
 0x81f   :  { %v2876_v20 = vpop.f32.mrb[21].mxu1 }
 0x820   :  { %v1114_v12 = vpop.f32.mrb[22].mxu1 }
 0x821   :  { %v1122_v5 = vpack.c.bf16 %v1114_v12, %v1111_v11  ;;  %v2877_v21 = vpop.f32.mrb[23].mxu1 }
 0x823   :  { %2883 = vmatmul.mubr.msk.bf16.vlgmr.msra.gmra.mrb[24].mxu0 %vm236_vm2, %v1122_v5  ;;  %v2610_v5 = vld [vmem:[%s4090_s3 + $0x87] ss:$0 sm:$0xff] }
 0x824   :  { %2910 = vmatprep.mubr.msk.bf16.mxu0 %vm3177_vm0, %v3176_v0  ;;  %v1226_v21 = vadd.f32 %v2610_v5, %v3420_v14 }
 0x8f6   :  { %v1177_v56 = vpop.f32.mrb[24].mxu0 }
 0x8f7   :  { %v1178_v59 = vadd.f32 %v2605_v55, %v1177_v56  ;;  %v2884_v61 = vpop.f32.mrb[25].mxu0  ;;  %v1228_v56 = vadd.f32 1.0, %v1226_v21 }
 0x8f8   :  { %v1180_v62 = vpop.f32.mrb[26].mxu0 }
 0x8f9   :  { %v1191_v8 = vmul.f32 %v1189_v58, %v1178_v59  ;;  %v1181_v22 = vadd.f32 %v2605_v55, %v1180_v62  ;;  %v2885_v24 = vpop.f32.mrb[27].mxu0  ;;  %v2611_v55 = vld [vmem:[%s4090_s3 + $0x86] ss:$0 sm:$0xff]  ;;  %v1227_v58 = vadd.f32 %v2610_v5, %v3424_v17  ;;  %v3079_v17 = vld [vmem:[%s4091_s2 + $0x94] ss:$24 sps:$4 sm:$0xff]  }
 0x8fa   :  { %v1237_v61 = vadd.f32 %v2611_v55, %v3409_v57  ;;  %v3077_v57 = vld [vmem:[%s4091_s2 + $0x90] ss:$24 sps:$4 sm:$0xff]  }
 0x8fb   :  { %v3672_v25 = vadd.f32 %v1191_v8, %v3308_v35  ;;  %v1192_v27 = vmul.f32 %v1190_v63, %v1181_v22  ;;  %v1229_v8 = vadd.f32 1.0, %v1227_v58 }
 0x8fd   :  { %v3675_v28 = vadd.f32 %v1192_v27, %v3312_v39  ;;  %v1195_v29 = vsel %vm236_vm2, %v3672_v25, 0.0  ;;  %v1238_v27 = vadd.f32 %v2611_v55, %v3416_v2  ;;  %v3082_v2 = vld [vmem:[%s4091_s2 + $0x6c] ss:$24 sps:$4 sm:$0xff]  }
 0x8fe   :  { %1196 = vadd.xlane.f32.xlu1 %v1195_v29 }
 0x8ff   :  { %v1198_v54 = vsel %vm236_vm2, %v3675_v28, 0.0 }
 0x900   :  { %1199 = vadd.xlane.f32.xlu0 %v1198_v54  ;;  %v3074_v54 = vld [vmem:[%s4091_s2 + $0x60] ss:$24 sps:$4 sm:$0xff]  }
 0x98b   :  { %v1197_v32 = vpop.xlane.xlu1 %1196 }
 0x98c   :  { %v1201_v60 = vmul.f32 0.03125, %v1197_v32 }
 0x98d   :  { %v1200_v33 = vpop.xlane.xlu0 %1199 }
 0x98e   :  { %v1203_v36 = vsub.f32 %v3672_v25, %v1201_v60  ;;  %v1202_v37 = vmul.f32 0.03125, %v1200_v33  ;;  %v3080_v60 = vld [vmem:[%s4091_s2 + $0x68] ss:$24 sps:$4 sm:$0xff]   ;;  %v3085_v33 = vld [vmem:[%s4091_s2 + $0x9c] ss:$24 sps:$4 sm:$0xff]  }
 0x990   :  { %v1204_v35 = vsub.f32 %v3675_v28, %v1202_v37  ;;  %v1205_v40 = vmul.f32 %v1203_v36, %v1203_v36  ;;  %v3088_v37 = vld [vmem:[%s4091_s2 + $0x74] ss:$24 sps:$4 sm:$0xff]  }
 0x992   :  { %v1207_v39 = vsel %vm236_vm2, %v1205_v40, 0.0  ;;  %v1206_v43 = vmul.f32 %v1204_v35, %v1204_v35  ;;  %v3091_v40 = vld [vmem:[%s4091_s2 + $0xa4] ss:$24 sps:$4 sm:$0xff]  }
 0x993   :  { %1208 = vadd.xlane.f32.xlu1 %v1207_v39  ;;  %v3089_v39 = vld [vmem:[%s4091_s2 + $0xa0] ss:$24 sps:$4 sm:$0xff]  }
 0x994   :  { %v1210_v44 = vsel %vm236_vm2, %v1206_v43, 0.0  ;;  %v3092_v43 = vld [vmem:[%s4088_s1 + $0x130] sm:$0xff]  }
 0x995   :  { %2895 = vmatpush3.bf16.msra.mxu0 %v3092_v43 }
 0x996   :  { %2896 = vmatprep.subr.bf16.mxu0 %v3176_v0 }
 0x997   :  { %1211 = vadd.xlane.f32.xlu1 %v1210_v44  ;;  %v3095_v44 = vld [vmem:[%s4088_s1 + $0x148] sm:$0xff]  }
 0xa20   :  { %v1209_v9 = vpop.xlane.xlu1 %1208 }
 0xa21   :  { %v1213_v13 = vmul.f32 0.03125, %v1209_v9  ;;  %v3099_v9 = vld [vmem:[%s4088_s1 + $0x168] sm:$0xff]  }
 0xa23   :  { %v1215_v1 = vadd.f32 1e-06, %v1213_v13  ;;  %v2612_v13 = vld [vmem:[%s4090_s3 + $0x94] ss:$0 sm:$0xff] }
 0xa24   :  { %v1212_v11 = vpop.xlane.xlu1 %1211 }
 0xa25   :  { %3148 = vrsqrt.f32 %v1215_v1  ;;  %v1214_v20 = vmul.f32 0.03125, %v1212_v11 }
 0xa27   :  { %v1216_v12 = vadd.f32 1e-06, %v1214_v20 }
 0xa29   :  { %3150 = vrsqrt.f32 %v1216_v12 }
 0xa2f   :  { %v3149_v31 = vpop.eup %3148 }
 0xa30   :  { %v1219_v59 = vmul.f32 %v3149_v31, %v1203_v36  ;;  %v3083_v36 = vld [vmem:[%s4091_s2 + $0x98] ss:$24 sps:$4 sm:$0xff]  }
 0xa32   :  { %v1230_v62 = vmul.f32 %v1228_v56, %v1219_v59 }
 0xa33   :  { %v3151_v63 = vpop.eup %3150 }
 0xa34   :  { %v1220_v22 = vmul.f32 %v3151_v63, %v1204_v35  ;;  %v1239_v24 = vadd.f32 %v1237_v61, %v1230_v62  ;;  %v3086_v35 = vld [vmem:[%s4091_s2 + $0x70] ss:$24 sps:$4 sm:$0xff]  }
 0xa36   :  { %v1231_v29 = vmul.f32 %v1229_v8, %v1220_v22 }
 0xa38   :  { %v1240_v14 = vadd.f32 %v1238_v27, %v1231_v29 }
 0xa3a   :  { %v1245_v32 = vpack.c.bf16 %v1240_v14, %v1239_v24 }
 0xa3c   :  { %2891 = vmatmul.mubr.msk.bf16.vlgmr.msra.gmra.mrb[24].mxu1 %vm236_vm2, %v1245_v32 }
 0xa3d   :  { %1521 = vmatpush1.bf16.msra.mxu1 %v3074_v54  ;;  %1552 = vmatprep.mubr.bf16.mxu1 %v3178_v18 }
 0xa3e   :  { %1522 = vmatprep.subr.bf16.mxu1 %v3079_v17 }
 0xa41   :  { %1523 = vmatpush1.bf16.msra.mxu1 %v3077_v57 }
 0xa42   :  { %1563 = vmatprep.subr.bf16.mxu1 %v3082_v2 }
 0xa44   :  { %2650 = vmatmul.mubr.msk.bf16.vlgmr.msra.gmra.mrb[28].mxu1 %vm236_vm2, %v3368_v38 }
 0xa45   :  { %1564 = vmatpush1.bf16.msra.mxu1 %v3080_v60  ;;  %1595 = vmatprep.mubr.bf16.mxu1 %v3178_v18 }
 0xa46   :  { %1565 = vmatprep.subr.bf16.mxu1 %v3085_v33 }
 0xa49   :  { %1566 = vmatpush1.bf16.msra.mxu1 %v3083_v36 }
 0xa4a   :  { %1606 = vmatprep.subr.bf16.mxu1 %v3088_v37 }
 0xa4c   :  { %2651 = vmatmul.mubr.msk.bf16.vlgmr.msra.gmra.mrb[32].mxu1 %vm236_vm2, %v3368_v38 }
 0xa4d   :  { %1607 = vmatpush1.bf16.msra.mxu1 %v3086_v35  ;;  %1638 = vmatprep.mubr.bf16.mxu1 %v3178_v18  ;;  %v3093_v18 = vld [vmem:[%s4088_s1 + $0x138] sm:$0xff]  }
 0xa4e   :  { %1608 = vmatprep.subr.bf16.mxu1 %v3091_v40  ;;  %2897 = vmatpush3.bf16.msra.mxu0 %v3093_v18 }
 0xa4f   :  { %2898 = vmatprep.subr.bf16.mxu0 %v3176_v0 }
 0xa51   :  { %1609 = vmatpush1.bf16.msra.mxu1 %v3089_v39 }
 0xa52   :  { %2914 = vmatprep.subr.bf16.mxu1 %v3176_v0 }
 0xa54   :  { %2652 = vmatmul.mubr.msk.bf16.vlgmr.msra.gmra.mrb[36].mxu1 %vm236_vm2, %v3368_v38  ;;  %v3094_v38 = vld [vmem:[%s4088_s1 + $0x140] sm:$0xff]  }
 0xa55   :  { %2918 = vmatprep.mubr.msk.bf16.mxu1 %vm3177_vm0, %v3176_v0  ;;  %2899 = vmatpush3.bf16.msra.mxu0 %v3094_v38 }
 0xa56   :  { %2900 = vmatprep.subr.bf16.mxu0 %v3176_v0 }
 0xa59   :  { %2901 = vmatpush3.bf16.msra.mxu0 %v3095_v44 }
 0xa5a   :  { %2902 = vmatprep.subr.bf16.mxu0 %v3176_v0 }
 0xa5d   :  { %2903 = vmatpush3.bf16.msra.mxu0 %v3096_v48 }
 0xa5e   :  { %2904 = vmatprep.subr.bf16.mxu0 %v3176_v0 }
 0xa61   :  { %2905 = vmatpush3.bf16.msra.mxu0 %v3097_v52  ;;  %v2616_v52 = vld [vmem:[%s4090_s3 + $0x88] ss:$0 sm:$0xff] }
 0xa62   :  { %2906 = vmatprep.subr.bf16.mxu0 %v3176_v0 }
 0xa65   :  { %2907 = vmatpush3.bf16.msra.mxu0 %v3098_v53  ;;  %v2617_v53 = vld [vmem:[%s4090_s3 + $0x95] ss:$0 sm:$0xff] }
 0xa66   :  { %2908 = vmatprep.subr.bf16.mxu0 %v3176_v0 }
 0xa69   :  { %2909 = vmatpush3.bf16.msra.mxu0 %v3099_v9 }
 0xa6a   :  { %2922 = vmatprep.subr.bf16.mxu0 %v3176_v0 }
 0xb0f   :  { %v1300_v1 = vpop.f32.mrb[24].mxu1 }
 0xb10   :  { %v1301_v11 = vadd.f32 %v2612_v13, %v1300_v1  ;;  %v2892_v20 = vpop.f32.mrb[25].mxu1 }
 0xb11   :  { %v1303_v12 = vpop.f32.mrb[26].mxu1 }
 0xb12   :  { %v1307_v5 = vmul.f32 %v1301_v11, %v1301_v11  ;;  %v1304_v21 = vadd.f32 %v2612_v13, %v1303_v12  ;;  %v2893_v31 = vpop.f32.mrb[27].mxu1  ;;  %v1330_v13 = vadd.f32 %v2616_v52, %v3422_v15  ;;  %v1331_v12 = vadd.f32 %v2616_v52, %v3426_v19 }
 0xb14   :  { %v1309_v55 = vmul.f32 %v1307_v5, %v1301_v11  ;;  %v1308_v56 = vmul.f32 %v1304_v21, %v1304_v21 }
 0xb16   :  { %v1311_v58 = vmul.f32 0.044715, %v1309_v55  ;;  %v1310_v59 = vmul.f32 %v1308_v56, %v1304_v21 }
 0xb17   :  { %v3786_v61 = vpop.f32.mrb[28].mxu1 }
 0xb18   :  { %v1313_v62 = vadd.f32 %v1311_v58, %v1301_v11  ;;  %v1312_v63 = vmul.f32 0.044715, %v1310_v59  ;;  %v3788_v8 = vpop.f32.mrb[29].mxu1 }
 0xb19   :  { %v3790_v22 = vpop.f32.mrb[30].mxu1 }
 0xb1a   :  { %v1315_v24 = vmul.f32 0.7978846, %v1313_v62  ;;  %v1314_v27 = vadd.f32 %v1312_v63, %v1304_v21  ;;  %v3792_v29 = vpop.f32.mrb[31].mxu1 }
 0xb1c   :  { %3152 = vtanh.f32 %v1315_v24  ;;  %v1316_v14 = vmul.f32 0.7978846, %v1314_v27 }
 0xb1e   :  { %3154 = vtanh.f32 %v1316_v14 }
 0xb1f   :  { %v3794_v54 = vpop.f32.mrb[32].mxu1 }
 0xb20   :  { %v3796_v32 = vpop.f32.mrb[33].mxu1 }
 0xb21   :  { %v3798_v17 = vpop.f32.mrb[34].mxu1 }
 0xb22   :  { %v3800_v57 = vpop.f32.mrb[35].mxu1 }
 0xb26   :  { %v3153_v2 = vpop.eup %3152 }
 0xb27   :  { %v1319_v60 = vadd.f32 1.0, %v3153_v2  ;;  %v3802_v33 = vpop.f32.mrb[36].mxu1 }
 0xb28   :  { %v3155_v36 = vpop.eup %3154  ;;  %v3804_v37 = vpop.f32.mrb[37].mxu1 }
 0xb29   :  { %v1321_v35 = vmul.f32 0.5, %v1319_v60  ;;  %v1320_v40 = vadd.f32 1.0, %v3155_v36  ;;  %v3806_v39 = vpop.f32.mrb[38].mxu1  ;;  %v3100_v36 = vld [vmem:[%s4088_s1 + $0x170] sm:$0xff]  }
 0xb2a   :  { %v3808_v43 = vpop.f32.mrb[39].mxu1  ;;  %2915 = vmatpush3.bf16.msra.mxu1 %v3100_v36 }
 0xb2b   :  { %v1322_v18 = vmul.f32 0.5, %v1320_v40  ;;  %v1323_v38 = vmul.f32 %v1321_v35, %v1301_v11  ;;  %v3101_v35 = vld [vmem:[%s4088_s1 + $0x180] sm:$0xff]   ;;  %v3102_v40 = vld [vmem:[%s4088_s1 + $0x178] sm:$0xff]   ;;  %2916 = vmatprep.subr.bf16.mxu1 %v3176_v0 }
 0xb2d   :  { %v1324_v44 = vmul.f32 %v1322_v18, %v1304_v21  ;;  %v3103_v18 = vld [vmem:[%s4088_s1 + $0x188] sm:$0xff]  }
 0xb2e   :  { %2917 = vmatpush3.bf16.msra.mxu1 %v3102_v40 }
 0xb2f   :  { %v1348_v48 = vpack.c.bf16 %v1324_v44, %v1323_v38  ;;  %2930 = vmatprep.subr.bf16.mxu1 %v3176_v0 }
 0xb31   :  { %2911 = vmatmul.mubr.bf16.vlgmr.msra.gmra.mrb[28].mxu0 %v1348_v48 }
 0xb32   :  { %2926 = vmatprep.mubr.msk.bf16.mxu0 %vm3177_vm0, %v3176_v0  ;;  %2923 = vmatpush3.bf16.msra.mxu0 %v3101_v35 }
 0xb33   :  { %2924 = vmatprep.subr.bf16.mxu0 %v3176_v0 }
 0xb36   :  { %2925 = vmatpush3.bf16.msra.mxu0 %v3103_v18 }
 0xb37   :  { %2938 = vmatprep.subr.bf16.mxu0 %v3176_v0 }
 0xc04   :  { %v1436_v9 = vpop.f32.mrb[28].mxu0 }
 0xc05   :  { %v1437_v1 = vadd.f32 %v2617_v53, %v1436_v9  ;;  %v2912_v20 = vpop.f32.mrb[29].mxu0 }
 0xc06   :  { %v1439_v11 = vpop.f32.mrb[30].mxu0 }
 0xc07   :  { %v1443_v5 = vmul.f32 %v1437_v1, %v1330_v13  ;;  %v1440_v21 = vadd.f32 %v2617_v53, %v1439_v11  ;;  %v2913_v31 = vpop.f32.mrb[31].mxu0  ;;  %v2653_v13 = vld [vmem:[%s4090_s3 + $0x8a] ss:$0 sm:$0xff]  ;;  %v2654_v11 = vld [vmem:[%s4090_s3 + $0x89] ss:$0 sm:$0xff] }
 0xc08   :  { %v1680_v1 = vadd.f32 %v2653_v13, %v3788_v8  ;;  %v1691_v31 = vadd.f32 %v2654_v11, %v3786_v61  ;;  %v3105_v61 = vld [vmem:[%s4088_s1 + $0x198] sm:$0xff]  }
 0xc09   :  { %v3821_v55 = vadd.f32 %v1443_v5, %v3672_v25  ;;  %v1444_v56 = vmul.f32 %v1440_v21, %v1331_v12  ;;  %v1681_v5 = vadd.f32 %v2653_v13, %v3792_v29 }
 0xc0a   :  { %v1682_v12 = vadd.f32 1.0, %v1680_v1 }
 0xc0b   :  { %v3824_v58 = vadd.f32 %v1444_v56, %v3675_v28  ;;  %v1649_v59 = vsel %vm236_vm2, %v3821_v55, 0.0 }
 0xc0c   :  { %1650 = vadd.xlane.f32.xlu1 %v1649_v59 }
 0xc0d   :  { %v1652_v15 = vsel %vm236_vm2, %v3824_v58, 0.0 }
 0xc10   :  { %1653 = vadd.xlane.f32.xlu1 %v1652_v15  ;;  %v1683_v15 = vadd.f32 1.0, %v1681_v5 }
 0xc99   :  { %v1651_v62 = vpop.xlane.xlu1 %1650 }
 0xc9a   :  { %v1655_v19 = vmul.f32 0.03125, %v1651_v62 }
 0xc9c   :  { %v1657_v63 = vsub.f32 %v3821_v55, %v1655_v19 }
 0xc9d   :  { %v1654_v24 = vpop.xlane.xlu1 %1653 }
 0xc9e   :  { %v1656_v27 = vmul.f32 0.03125, %v1654_v24  ;;  %v1659_v25 = vmul.f32 %v1657_v63, %v1657_v63  ;;  %v1692_v24 = vadd.f32 %v2654_v11, %v3790_v22  ;;  %v2655_v22 = vld [vmem:[%s4090_s3 + $0x98] ss:$0 sm:$0xff] }
 0xca0   :  { %v1658_v14 = vsub.f32 %v3824_v58, %v1656_v27  ;;  %v1661_v28 = vsel %vm236_vm2, %v1659_v25, 0.0  ;;  %v3104_v25 = vld [vmem:[%s4088_s1 + $0x190] sm:$0xff]  }
 0xca1   :  { %1662 = vadd.xlane.f32.xlu1 %v1661_v28 }
 0xca2   :  { %v1660_v2 = vmul.f32 %v1658_v14, %v1658_v14 }
 0xca4   :  { %v1664_v60 = vsel %vm236_vm2, %v1660_v2, 0.0 }
 0xca5   :  { %1665 = vadd.xlane.f32.xlu1 %v1664_v60 }
 0xd2e   :  { %v1663_v38 = vpop.xlane.xlu1 %1662 }
 0xd2f   :  { %v1667_v44 = vmul.f32 0.03125, %v1663_v38 }
 0xd31   :  { %v1669_v48 = vadd.f32 1e-06, %v1667_v44  ;;  %v2663_v44 = vld [vmem:[%s4090_s3 + $0x9a] ss:$0 sm:$0xff] }
 0xd32   :  { %v1666_v52 = vpop.xlane.xlu1 %1665 }
 0xd33   :  { %3156 = vrsqrt.f32 %v1669_v48  ;;  %v1668_v53 = vmul.f32 0.03125, %v1666_v52 }
 0xd35   :  { %v1670_v9 = vadd.f32 1e-06, %v1668_v53 }
 0xd37   :  { %3158 = vrsqrt.f32 %v1670_v9 }
 0xd3d   :  { %v3157_v20 = vpop.eup %3156 }
 0xd3e   :  { %v1673_v21 = vmul.f32 %v3157_v20, %v1657_v63 }
 0xd40   :  { %v1684_v56 = vmul.f32 %v1682_v12, %v1673_v21 }
 0xd41   :  { %v3159_v59 = vpop.eup %3158 }
 0xd42   :  { %v1674_v62 = vmul.f32 %v3159_v59, %v1658_v14  ;;  %v1693_v19 = vadd.f32 %v1691_v31, %v1684_v56 }
 0xd44   :  { %v1685_v27 = vmul.f32 %v1683_v15, %v1674_v62 }
 0xd46   :  { %v1694_v8 = vadd.f32 %v1692_v24, %v1685_v27 }
 0xd48   :  { %v1695_v28 = vpack.c.bf16 %v1694_v8, %v1693_v19 }
 0xd4a   :  { %2919 = vmatmul.mubr.msk.bf16.vlgmr.msra.gmra.mrb[40].mxu1 %vm236_vm2, %v1695_v28  ;;  %2927 = vmatmul.mubr.msk.bf16.vlgmr.msra.gmra.mrb[32].mxu0 %vm236_vm2, %v1695_v28 }
 0xd4b   :  { %2931 = vmatpush3.bf16.msra.mxu1 %v3104_v25  ;;  %2934 = vmatprep.mubr.msk.bf16.mxu1 %vm3177_vm0, %v3176_v0 }
 0xd4c   :  { %2932 = vmatprep.subr.bf16.mxu1 %v3176_v0  ;;  %2942 = vmatprep.mubr.msk.bf16.mxu0 %vm3177_vm0, %v3176_v0 }
 0xd4f   :  { %2933 = vmatpush3.bf16.msra.mxu1 %v3105_v61 }
 0xd50   :  { %2946 = vmatprep.subr.bf16.mxu1 %v3176_v0 }
 0xd52   :  { %2935 = vmatmul.mubr.msk.bf16.vlgmr.msra.gmra.mrb[44].mxu1 %vm236_vm2, %v1695_v28 }
 0xd53   :  { %2947 = vmatpush3.bf16.msra.mxu1 %v3621_v3  ;;  %2954 = vmatprep.mubr.msk.bf16.mxu1 %vm3177_vm0, %v3176_v0  ;;  %v2659_v3 = vld [vmem:[%s4090_s3 + $0x99] ss:$0 sm:$0xff] }
 0xd54   :  { %2948 = vmatprep.subr.bf16.mxu1 %v3176_v0 }
 0xd57   :  { %2949 = vmatpush3.bf16.msra.mxu1 %v3628_v4 }
 0xd58   :  { %2950 = vmatprep.subr.bf16.mxu1 %v3176_v0 }
 0xd5b   :  { %2951 = vmatpush3.bf16.msra.mxu1 %v3634_v6 }
 0xd5c   :  { %2952 = vmatprep.subr.bf16.mxu1 %v3176_v0 }
 0xd5f   :  { %2953 = vmatpush3.bf16.msra.mxu1 %v3641_v7 }
 0xd60   :  { %2970 = vmatprep.subr.bf16.mxu1 %v3176_v0 }
 0xe1d   :  { %v1754_v29 = vpop.f32.mrb[40].mxu1  ;;  %v1816_v4 = vpop.f32.mrb[32].mxu0 }
 0xe1e   :  { %v1817_v63 = vadd.f32 %v2659_v3, %v1816_v4  ;;  %v2920_v14 = vpop.f32.mrb[41].mxu1  ;;  %v2928_v2 = vpop.f32.mrb[33].mxu0  ;;  %v3891_v36 = vadd.f32 %v2655_v22, %v1754_v29 }
 0xe1f   :  { %v1757_v6 = vpop.f32.mrb[42].mxu1  ;;  %v1819_v60 = vpop.f32.mrb[34].mxu0 }
 0xe20   :  { %v3893_v7 = vadd.f32 %v2655_v22, %v1757_v6  ;;  %v2921_v35 = vpop.f32.mrb[43].mxu1  ;;  %1885 = vxpose.xlu1.b32.start [1/2] (short) (narrow) %v1817_v63, 32  ;;  %v2929_v40 = vpop.f32.mrb[35].mxu0  ;;  %v1820_v38 = vadd.f32 %v2659_v3, %v1819_v60 }
 0xe22   :  { %v1987_v18 = vpack.c.bf16 %v3893_v7, %v3891_v36 }
 0xe24   :  { %1886 = vxpose.xlu1.b32.end [2/2] (short) (narrow) %v1820_v38, 32 }
 0xe25   :  { %v1878_v48 = vpop.f32.mrb[44].mxu1 }
 0xe26   :  { %v1879_v52 = vadd.f32 %v2663_v44, %v1878_v48  ;;  %v2936_v53 = vpop.f32.mrb[45].mxu1 }
 0xe27   :  { %v1881_v9 = vpop.f32.mrb[46].mxu1 }
 0xe28   :  { %v2937_v13 = vpop.f32.mrb[47].mxu1  ;;  %v1882_v1 = vadd.f32 %v2663_v44, %v1881_v9  ;;  %v3901_v20 = vmul.f32 %v1879_v52, %v3463_v41  ;;  %v3904_v11 = vmul.f32 %v1879_v52, %v3468_v42  ;;  %v3907_v12 = vmul.f32 %v1879_v52, %v3473_v45 }
 0xe29   :  { %v3910_v5 = vmul.f32 %v1879_v52, %v3478_v46 }
 0xe2a   :  { %v1976_v21 = vmul.f32 %v1882_v1, %v3483_v47  ;;  %v1978_v31 = vmul.f32 %v1882_v1, %v3488_v49  ;;  %v1980_v56 = vmul.f32 %v1882_v1, %v3493_v50  ;;  %v3916_v59 = vmul.f32 %v1882_v1, %v3498_v51 }
 0xe2c   :  { %v1983_v41 = vpack.c.bf16 %v1976_v21, %v3901_v20  ;;  %v1984_v42 = vpack.c.bf16 %v1978_v31, %v3904_v11  ;;  %v1985_v15 = vpack.c.bf16 %v1980_v56, %v3907_v12  ;;  %v1986_v45 = vpack.c.bf16 %v3916_v59, %v3910_v5 }
 0xea0   :  { %v1901_v46 = vpop.trf.xlu1 }
 0xea1   :  { %1921 = vrot.lane.b32.xlu0 %v1901_v46, %s3179_s8 }
 0xea4   :  { %v1902_v47 = vpop.trf.xlu1 }
 0xea5   :  { %1933 = vrot.lane.b32.xlu0 %v1901_v46, %s3180_s9 }
 0xea8   :  { %v1903_v49 = vpop.trf.xlu1 }
 0xea9   :  { %1945 = vrot.lane.b32.xlu0 %v1901_v46, %s3181_s10 }
 0xeac   :  { %v1904_v50 = vpop.trf.xlu1 }
 0xead   :  { %1923 = vrot.lane.b32.xlu0 %v1902_v47, %s3179_s8  ;;  %1939 = vrot.lane.b32.xlu1 %v1904_v50, %s3180_s9 }
 0xeb1   :  { %1935 = vrot.lane.b32.xlu0 %v1902_v47, %s3180_s9 }
 0xeb5   :  { %1947 = vrot.lane.b32.xlu0 %v1902_v47, %s3181_s10 }
 0xeb9   :  { %1925 = vrot.lane.b32.xlu0 %v1903_v49, %s3179_s8 }
 0xebd   :  { %1937 = vrot.lane.b32.xlu0 %v1903_v49, %s3180_s9 }
 0xec1   :  { %1927 = vrot.lane.b32.xlu0 %v1904_v50, %s3179_s8 }
 0xec5   :  { %1949 = vrot.lane.b32.xlu0 %v1903_v49, %s3181_s10 }
 0xec9   :  { %1951 = vrot.lane.b32.xlu0 %v1904_v50, %s3181_s10 }
 0xf13   :  { %v1922_v51 = vpop.permute.xlu0 %1921 }
 0xf14   :  { %v1957_v8 = vsel %vm911_vm3, %v1901_v46, %v1922_v51 }
 0xf17   :  { %v1934_v62 = vpop.permute.xlu0 %1933 }
 0xf18   :  { %v1961_v25 = vsel %vm236_vm2, %v1957_v8, %v1934_v62 }
 0xf1b   :  { %v1946_v19 = vpop.permute.xlu0 %1945 }
 0xf1c   :  { %v1965_v28 = vsel %vm920_vm4, %v1961_v25, %v1946_v19 }
 0xf1d   :  { %v1969_v4 = vmul.f32 %v1965_v28, %v3549_v23 }
 0xf1f   :  { %v1924_v24 = vpop.permute.xlu0 %1923  ;;  %v1940_v38 = vpop.permute.xlu1 %1939 }
 0xf20   :  { %v1958_v61 = vsel %vm911_vm3, %v1902_v47, %v1924_v24 }
 0xf23   :  { %v1936_v27 = vpop.permute.xlu0 %1935 }
 0xf24   :  { %v1962_v3 = vsel %vm236_vm2, %v1958_v61, %v1936_v27  ;;  %v3107_v27 = vld [vmem:[%s4088_s1 + $0x1a8] sm:$0xff]  }
 0xf27   :  { %v1948_v22 = vpop.permute.xlu0 %1947 }
 0xf28   :  { %v1966_v29 = vsel %vm920_vm4, %v1962_v3, %v1948_v22  ;;  %v2674_v22 = vld [vmem:[%s4090_s3 + $0x8b] ss:$0 sm:$0xff] }
 0xf29   :  { %v1970_v63 = vmul.f32 %v1966_v29, %v3556_v26  ;;  %v2670_v29 = vld [vmem:[%s4090_s3 + $0x9b] ss:$0 sm:$0xff] }
 0xf2b   :  { %v1973_v14 = vpack.c.bf16 %v1970_v63, %v1969_v4  ;;  %v1926_v2 = vpop.permute.xlu0 %1925  ;;  %v2209_v63 = vadd.f32 %v2674_v22, %v3794_v54 }
 0xf2c   :  { %v1959_v40 = vsel %vm911_vm3, %v1903_v49, %v1926_v2 }
 0xf2d   :  { %2939 = vmatpush3.bf16.msra.mxu0 %v1973_v14 }
 0xf2e   :  { %2940 = vmatprep.subr.bf16.mxu0 %v3176_v0 }
 0xf2f   :  { %v1938_v6 = vpop.permute.xlu0 %1937 }
 0xf30   :  { %v1963_v48 = vsel %vm236_vm2, %v1959_v40, %v1938_v6 }
 0xf33   :  { %v1928_v60 = vpop.permute.xlu0 %1927 }
 0xf34   :  { %v1960_v44 = vsel %vm911_vm3, %v1904_v50, %v1928_v60  ;;  %v2210_v60 = vadd.f32 %v2674_v22, %v3798_v17 }
 0xf35   :  { %v1964_v23 = vsel %vm236_vm2, %v1960_v44, %v1940_v38 }
 0xf37   :  { %v1950_v35 = vpop.permute.xlu0 %1949 }
 0xf38   :  { %v1967_v52 = vsel %vm920_vm4, %v1963_v48, %v1950_v35 }
 0xf39   :  { %v1971_v9 = vmul.f32 %v1967_v52, %v3569_v10 }
 0xf3b   :  { %v1952_v26 = vpop.permute.xlu0 %1951 }
 0xf3c   :  { %v1968_v53 = vsel %vm920_vm4, %v1964_v23, %v1952_v26 }
 0xf3d   :  { %v1972_v13 = vmul.f32 %v1968_v53, %v3575_v16 }
 0xf3f   :  { %v1974_v1 = vpack.c.bf16 %v1972_v13, %v1971_v9 }
 0xf41   :  { %2941 = vmatpush3.bf16.msra.mxu0 %v1974_v1 }
 0xf42   :  { %2958 = vmatprep.subr.bf16.mxu0 %v3176_v0 }
 0xf44   :  { %2943 = vmatmul.mubr.msk.bf16.vlgmr.msra.gmra.mrb[36].mxu0 %vm236_vm2, %v1987_v18 }
 0xf45   :  { %2959 = vmatpush3.bf16.msra.mxu0 %v1983_v41  ;;  %2966 = vmatprep.mubr.msk.bf16.mxu0 %vm3177_vm0, %v3176_v0 }
 0xf46   :  { %2960 = vmatprep.subr.bf16.mxu0 %v3176_v0 }
 0xf49   :  { %2961 = vmatpush3.bf16.msra.mxu0 %v1984_v42 }
 0xf4a   :  { %2962 = vmatprep.subr.bf16.mxu0 %v3176_v0 }
 0xf4d   :  { %2963 = vmatpush3.bf16.msra.mxu0 %v1985_v15 }
 0xf4e   :  { %2964 = vmatprep.subr.bf16.mxu0 %v3176_v0 }
 0xf51   :  { %2965 = vmatpush3.bf16.msra.mxu0 %v1986_v45 }
 0xf52   :  { %2978 = vmatprep.subr.bf16.mxu0 %v3176_v0 }
0x1017   :  { %v2025_v10 = vpop.f32.mrb[36].mxu0 }
0x1018   :  { %v2026_v16 = vadd.f32 %v2025_v10, %v3607_v30  ;;  %v2944_v36 = vpop.f32.mrb[37].mxu0 }
0x1019   :  { %v2028_v7 = vpop.f32.mrb[38].mxu0  ;;  %v3108_v36 = vld [vmem:[%s4088_s1 + $0x1b0] sm:$0xff]  }
0x101a   :  { %v2029_v18 = vadd.f32 %v2028_v7, %v3612_v34  ;;  %v2945_v20 = vpop.f32.mrb[39].mxu0  ;;  %v2032_v11 = vsel %vm331_vm1, %v2026_v16, -inf  ;;  %v3106_v34 = vld [vmem:[%s4088_s1 + $0x1a0] sm:$0xff]   ;;  %v3109_v7 = vld [vmem:[%s4088_s1 + $0x1b8] sm:$0xff]  }
0x101b   :  { %2033 = vmax.xlane.f32.xlu0 %v2032_v11 }
0x101c   :  { %v2035_v12 = vsel %vm331_vm1, %v2029_v18, -inf }
0x101d   :  { %2036 = vmax.xlane.f32.xlu1 %v2035_v12 }
0x10a8   :  { %v2034_v5 = vpop.xlane.xlu0 %2033 }
0x10a9   :  { %v2038_v21 = vsub.f32 %v2026_v16, %v2034_v5 }
0x10aa   :  { %v2037_v31 = vpop.xlane.xlu1 %2036 }
0x10ab   :  { %v2040_v56 = vmul.f32 1.442695, %v2038_v21  ;;  %v2039_v59 = vsub.f32 %v2029_v18, %v2037_v31  ;;  %v2675_v31 = vld [vmem:[%s4090_s3 + $0x8d] ss:$0 sm:$0xff] }
0x10ad   :  { %v2042_v41 = vmul.f32 1.442695, %v2039_v59  ;;  %3160 = vpow2.f32 %v2040_v56  ;;  %v2246_v56 = vadd.f32 %v2675_v31, %v3802_v33 }
0x10af   :  { %3162 = vpow2.f32 %v2042_v41  ;;  %v2676_v41 = vld [vmem:[%s4090_s3 + $0x8c] ss:$0 sm:$0xff] }
0x10b7   :  { %v3161_v30 = vpop.eup %3160 }
0x10b9   :  { %v3163_v42 = vpop.eup %3162 }
0x10ba   :  { %v2044_v15 = vpack.c.bf16 %v3163_v42, %v3161_v30 }
0x10bc   :  { %2955 = vmatmul.mubr.msk.bf16.vlgmr.msra.gmra.mrb[48].mxu1 %vm331_vm1, %v2044_v15 }
0x10bd   :  { %2974 = vmatprep.mubr.msk.bf16.mxu1 %vm3177_vm0, %v3176_v0  ;;  %2971 = vmatpush3.bf16.msra.mxu1 %v3106_v34  ;;  %v2257_v34 = vadd.f32 %v2676_v41, %v3796_v32  ;;  %v3111_v32 = vld [vmem:[%s4088_s1 + $0x1c8] sm:$0xff]  }
0x10be   :  { %2972 = vmatprep.subr.bf16.mxu1 %v3176_v0 }
0x10c1   :  { %2973 = vmatpush3.bf16.msra.mxu1 %v3107_v27  ;;  %v3114_v27 = vld [vmem:[%s4088_s1 + $0x1e0] sm:$0xff]  }
0x10c2   :  { %2986 = vmatprep.subr.bf16.mxu1 %v3176_v0 }
0x118f   :  { %v2082_v45 = vpop.f32.mrb[48].mxu1 }
0x1190   :  { %3164 = vrcp.f32 %v2082_v45  ;;  %v2956_v46 = vpop.f32.mrb[49].mxu1 }
0x1191   :  { %v2085_v47 = vpop.f32.mrb[50].mxu1 }
0x1192   :  { %3166 = vrcp.f32 %v2085_v47  ;;  %v2957_v49 = vpop.f32.mrb[51].mxu1 }
0x119a   :  { %v3165_v50 = vpop.eup %3164 }
0x119b   :  { %v2091_v62 = vmul.f32 %v3165_v50, %v3161_v30  ;;  %v2248_v30 = vadd.f32 1.0, %v2246_v56 }
0x119c   :  { %v3167_v51 = vpop.eup %3166 }
0x119d   :  { %v2092_v19 = vmul.f32 %v3167_v51, %v3163_v42  ;;  %v2247_v42 = vadd.f32 %v2675_v31, %v3806_v39  ;;  %v2258_v51 = vadd.f32 %v2676_v41, %v3800_v57  ;;  %v3110_v39 = vld [vmem:[%s4088_s1 + $0x1c0] sm:$0xff]   ;;  %v3112_v57 = vld [vmem:[%s4088_s1 + $0x1d0] sm:$0xff]  }
0x119f   :  { %v2093_v24 = vpack.c.bf16 %v2092_v19, %v2091_v62  ;;  %v2249_v47 = vadd.f32 1.0, %v2247_v42 }
0x11a1   :  { %2967 = vmatmul.mubr.msk.bf16.vlgmr.msra.gmra.mrb[40].mxu0 %vm331_vm1, %v2093_v24  ;;  %v3113_v24 = vld [vmem:[%s4088_s1 + $0x1d8] sm:$0xff]  }
0x11a2   :  { %2982 = vmatprep.mubr.msk.bf16.mxu0 %vm3177_vm0, %v3176_v0  ;;  %2979 = vmatpush3.bf16.msra.mxu0 %v3108_v36  ;;  %v3118_v36 = vld [vmem:[%s4088_s1 + $0xd0] sm:$0xff]  }
0x11a3   :  { %2980 = vmatprep.subr.bf16.mxu0 %v3176_v0 }
0x11a6   :  { %2981 = vmatpush3.bf16.msra.mxu0 %v3109_v7  ;;  %v3119_v7 = vld [vmem:[%s4088_s1 + $0xd8] sm:$0xff]  }
0x11a7   :  { %3006 = vmatprep.subr.bf16.mxu0 %v3176_v0 }
0x1274   :  { %v2131_v8 = vpop.f32.mrb[40].mxu0 }
0x1275   :  { %v2968_v25 = vpop.f32.mrb[41].mxu0 }
0x1276   :  { %v2134_v28 = vpop.f32.mrb[42].mxu0  ;;  %v3116_v25 = vld [vmem:[%s4088_s1 + $0x1f0] sm:$0xff]  }
0x1277   :  { %v2142_v61 = vpack.c.bf16 %v2134_v28, %v2131_v8  ;;  %v2969_v3 = vpop.f32.mrb[43].mxu0  ;;  %v3115_v8 = vld [vmem:[%s4088_s1 + $0x1e8] sm:$0xff]   ;;  %v3117_v28 = vld [vmem:[%s4088_s1 + $0x1f8] sm:$0xff]  }
0x1279   :  { %2975 = vmatmul.mubr.msk.bf16.vlgmr.msra.gmra.mrb[52].mxu1 %vm236_vm2, %v2142_v61  ;;  %v2677_v61 = vld [vmem:[%s4090_s3 + $0x9c] ss:$0 sm:$0xff] }
0x127a   :  { %3002 = vmatprep.mubr.msk.bf16.mxu1 %vm3177_vm0, %v3176_v0  ;;  %2987 = vmatpush3.bf16.msra.mxu1 %v3110_v39 }
0x127b   :  { %2988 = vmatprep.subr.bf16.mxu1 %v3176_v0 }
0x127e   :  { %2989 = vmatpush3.bf16.msra.mxu1 %v3111_v32 }
0x127f   :  { %2990 = vmatprep.subr.bf16.mxu1 %v3176_v0 }
0x1282   :  { %2991 = vmatpush3.bf16.msra.mxu1 %v3112_v57 }
0x1283   :  { %2992 = vmatprep.subr.bf16.mxu1 %v3176_v0 }
0x1286   :  { %2993 = vmatpush3.bf16.msra.mxu1 %v3113_v24 }
0x1287   :  { %2994 = vmatprep.subr.bf16.mxu1 %v3176_v0 }
0x128a   :  { %2995 = vmatpush3.bf16.msra.mxu1 %v3114_v27 }
0x128b   :  { %2996 = vmatprep.subr.bf16.mxu1 %v3176_v0 }
0x128e   :  { %2997 = vmatpush3.bf16.msra.mxu1 %v3115_v8 }
0x128f   :  { %2998 = vmatprep.subr.bf16.mxu1 %v3176_v0 }
0x1292   :  { %2999 = vmatpush3.bf16.msra.mxu1 %v3116_v25 }
0x1293   :  { %3000 = vmatprep.subr.bf16.mxu1 %v3176_v0 }
0x1296   :  { %3001 = vmatpush3.bf16.msra.mxu1 %v3117_v28 }
0x134c   :  { %v2197_v4 = vpop.f32.mrb[52].mxu1 }
0x134d   :  { %v2198_v14 = vadd.f32 %v2670_v29, %v2197_v4  ;;  %v2976_v2 = vpop.f32.mrb[53].mxu1 }
0x134e   :  { %v2200_v6 = vpop.f32.mrb[54].mxu1 }
0x134f   :  { %v2211_v35 = vmul.f32 %v2209_v63, %v2198_v14  ;;  %v2201_v40 = vadd.f32 %v2670_v29, %v2200_v6  ;;  %v2977_v38 = vpop.f32.mrb[55].mxu1 }
0x1351   :  { %v3993_v44 = vadd.f32 %v2211_v35, %v3821_v55  ;;  %v2212_v48 = vmul.f32 %v2210_v60, %v2201_v40 }
0x1353   :  { %v3996_v52 = vadd.f32 %v2212_v48, %v3824_v58  ;;  %v2215_v23 = vsel %vm236_vm2, %v3993_v44, 0.0 }
0x1354   :  { %2216 = vadd.xlane.f32.xlu0 %v2215_v23 }
0x1355   :  { %v2218_v54 = vsel %vm236_vm2, %v3996_v52, 0.0 }
0x1358   :  { %2219 = vadd.xlane.f32.xlu0 %v2218_v54 }
0x13e1   :  { %v2217_v26 = vpop.xlane.xlu0 %2216 }
0x13e2   :  { %v2221_v17 = vmul.f32 0.03125, %v2217_v26 }
0x13e4   :  { %v2223_v53 = vsub.f32 %v3993_v44, %v2221_v17 }
0x13e5   :  { %v2220_v9 = vpop.xlane.xlu0 %2219 }
0x13e6   :  { %v2222_v13 = vmul.f32 0.03125, %v2220_v9  ;;  %v2225_v55 = vmul.f32 %v2223_v53, %v2223_v53 }
0x13e8   :  { %v2224_v1 = vsub.f32 %v3996_v52, %v2222_v13  ;;  %v2227_v58 = vsel %vm236_vm2, %v2225_v55, 0.0 }
0x13e9   :  { %2228 = vadd.xlane.f32.xlu0 %v2227_v58 }
0x13ea   :  { %v2226_v10 = vmul.f32 %v2224_v1, %v2224_v1 }
0x13ec   :  { %v2230_v16 = vsel %vm236_vm2, %v2226_v10, 0.0 }
0x13ed   :  { %2231 = vadd.xlane.f32.xlu0 %v2230_v16 }
0x1476   :  { %v2229_v18 = vpop.xlane.xlu0 %2228 }
0x1477   :  { %v2233_v20 = vmul.f32 0.03125, %v2229_v18  ;;  %v2681_v18 = vld [vmem:[%s4090_s3 + $0x8e] ss:$0 sm:$0xff] }
0x1479   :  { %v2235_v11 = vadd.f32 1e-06, %v2233_v20  ;;  %v2682_v20 = vld [vmem:[%s4090_s3 + $0x9d] ss:$0 sm:$0xff] }
0x147a   :  { %v2232_v12 = vpop.xlane.xlu0 %2231 }
0x147b   :  { %3168 = vrsqrt.f32 %v2235_v11  ;;  %v2234_v5 = vmul.f32 0.03125, %v2232_v12  ;;  %v2350_v12 = vadd.f32 %v2681_v18, %v3804_v37  ;;  %v2691_v37 = vld [vmem:[%s4090_s3 + $0x82] ss:$0 sm:$0xff] }
0x147d   :  { %v2236_v21 = vadd.f32 1e-06, %v2234_v5 }
0x147f   :  { %3170 = vrsqrt.f32 %v2236_v21 }
0x1485   :  { %v3169_v59 = vpop.eup %3168 }
0x1486   :  { %v2239_v15 = vmul.f32 %v3169_v59, %v2223_v53 }
0x1488   :  { %v2250_v45 = vmul.f32 %v2248_v30, %v2239_v15 }
0x1489   :  { %v3171_v46 = vpop.eup %3170 }
0x148a   :  { %v2240_v49 = vmul.f32 %v3171_v46, %v2224_v1  ;;  %v2259_v50 = vadd.f32 %v2257_v34, %v2250_v45 }
0x148c   :  { %v2251_v62 = vmul.f32 %v2249_v47, %v2240_v49 }
0x148e   :  { %v2260_v33 = vadd.f32 %v2258_v51, %v2251_v62 }
0x1490   :  { %v2265_v19 = vpack.c.bf16 %v2260_v33, %v2259_v50 }
0x1492   :  { %2983 = vmatmul.mubr.msk.bf16.vlgmr.msra.gmra.mrb[44].mxu0 %vm236_vm2, %v2265_v19 }
0x1493   :  { %3010 = vmatprep.mubr.msk.bf16.mxu0 %vm3177_vm0, %v3176_v0  ;;  %3007 = vmatpush3.bf16.msra.mxu0 %v3118_v36 }
0x1494   :  { %3008 = vmatprep.subr.bf16.mxu0 %v3176_v0  ;;  %v2351_v0 = vadd.f32 %v2681_v18, %v3808_v43 }
0x1497   :  { %3009 = vmatpush3.bf16.msra.mxu0 %v3119_v7 }
0x1565   :  { %v2320_v3 = vpop.f32.mrb[44].mxu0 }
0x1566   :  { %v2321_v22 = vadd.f32 %v2677_v61, %v2320_v3  ;;  %v2984_v29 = vpop.f32.mrb[45].mxu0 }
0x1567   :  { %v2323_v4 = vpop.f32.mrb[46].mxu0 }
0x1568   :  { %v2327_v63 = vmul.f32 %v2321_v22, %v2321_v22  ;;  %v2324_v14 = vadd.f32 %v2677_v61, %v2323_v4  ;;  %v2985_v2 = vpop.f32.mrb[47].mxu0 }
0x156a   :  { %v2329_v6 = vmul.f32 %v2327_v63, %v2321_v22  ;;  %v2328_v60 = vmul.f32 %v2324_v14, %v2324_v14 }
0x156c   :  { %v2331_v35 = vmul.f32 0.044715, %v2329_v6  ;;  %v2330_v40 = vmul.f32 %v2328_v60, %v2324_v14 }
0x156e   :  { %v2333_v38 = vadd.f32 %v2331_v35, %v2321_v22  ;;  %v2332_v48 = vmul.f32 0.044715, %v2330_v40 }
0x1570   :  { %v2335_v23 = vmul.f32 0.7978846, %v2333_v38  ;;  %v2334_v54 = vadd.f32 %v2332_v48, %v2324_v14 }
0x1572   :  { %3172 = vtanh.f32 %v2335_v23  ;;  %v2336_v26 = vmul.f32 0.7978846, %v2334_v54 }
0x1574   :  { %3174 = vtanh.f32 %v2336_v26 }
0x157c   :  { %v3173_v17 = vpop.eup %3172 }
0x157d   :  { %v2339_v53 = vadd.f32 1.0, %v3173_v17 }
0x157e   :  { %v3175_v9 = vpop.eup %3174 }
0x157f   :  { %v2341_v13 = vmul.f32 0.5, %v2339_v53  ;;  %v2340_v55 = vadd.f32 1.0, %v3175_v9 }
0x1581   :  { %v2342_v1 = vmul.f32 0.5, %v2340_v55  ;;  %v2343_v58 = vmul.f32 %v2341_v13, %v2321_v22 }
0x1583   :  { %v2344_v10 = vmul.f32 %v2342_v1, %v2324_v14 }
0x1585   :  { %v2368_v16 = vpack.c.bf16 %v2344_v10, %v2343_v58 }
0x1587   :  { %3003 = vmatmul.mubr.bf16.vlgmr.msra.gmra.mrb[56].mxu1 %v2368_v16 }
0x165a   :  { %v2456_v11 = vpop.f32.mrb[56].mxu1 }
0x165b   :  { %v2457_v5 = vadd.f32 %v2682_v20, %v2456_v11  ;;  %v3004_v21 = vpop.f32.mrb[57].mxu1 }
0x165c   :  { %v2459_v31 = vpop.f32.mrb[58].mxu1 }
0x165d   :  { %v2463_v56 = vmul.f32 %v2457_v5, %v2350_v12  ;;  %v2460_v59 = vadd.f32 %v2682_v20, %v2459_v31  ;;  %v3005_v41 = vpop.f32.mrb[59].mxu1 }
0x165f   :  { %v2464_v30 = vmul.f32 %v2460_v59, %v2351_v0  ;;  %v2465_v42 = vadd.f32 %v2463_v56, %v3993_v44 }
0x1661   :  { %v2466_v15 = vadd.f32 %v2464_v30, %v3996_v52 }
0x1663   :  { %v2471_v34 = vpack.c.bf16 %v2466_v15, %v2465_v42 }
0x1665   :  { %3011 = vmatmul.mubr.msk.bf16.vlgmr.msra.gmra.mrb[48].mxu0 %vm236_vm2, %v2471_v34 }
0x1738   :  { %v2526_v45 = vpop.f32.mrb[48].mxu0 }
0x1739   :  { %v2527_v46 = vadd.f32 %v2691_v37, %v2526_v45  ;;  %v3012_v47 = vpop.f32.mrb[49].mxu0 }
0x173a   :  { %v2529_v49 = vpop.f32.mrb[50].mxu0 }
0x173b   :  { %2533 = vst [vmem:[%s4092_s4] sm:$0xff] %v2527_v46  ;;  %v2530_v43 = vadd.f32 %v2691_v37, %v2529_v49  ;;  %v3013_v50 = vpop.f32.mrb[51].mxu0 }
0x173d   :  { %2534 = vst [vmem:[%s4092_s4 + $0x8] sm:$0xff] %v2530_v43 }

</bundles_post_ra>
